<compile_context>
chip_gen: v5e
topology: v5e:2x2
jax: 0.10.0
libtpu: 0.0.40
codegen_flags: <defaults>
</compile_context>

<pallas_src>
import math
import jax
import jax.numpy as jnp
from jax.experimental import pallas as pl
from jax.experimental.pallas import tpu as pltpu


_LANE = 128
_TILE_M_CAP = 512   # rows per grid step; multiple of 16 (bf16 sublane packing)


def _matmul_bn_relu_kernel(x_ref, w_ref, scale_ref, bias_ref, o_ref):
    # MXU matmul (bf16 operands, f32 accumulate) + fused BN scale/bias + ReLU.
    acc = jnp.dot(x_ref[...], w_ref[...], preferred_element_type=jnp.float32)
    o_ref[...] = jnp.maximum(acc * scale_ref[...] + bias_ref[...], 0.0).astype(o_ref.dtype)


def _matmul_bn_relu(x2d, w2d, scale_row, bias_row, out_dtype):
    """(M, K) @ (K, Nc) with fused per-column scale/bias + ReLU, tiled over M."""
    M, K = x2d.shape
    _, Nc = w2d.shape

    tile_m = M if M <= _TILE_M_CAP else _TILE_M_CAP
    grid_m = pl.cdiv(M, tile_m)

    cost = pl.CostEstimate(
        flops=2 * M * K * Nc,
        transcendentals=0,
        bytes_accessed=(x2d.size * x2d.dtype.itemsize
                        + w2d.size * w2d.dtype.itemsize
                        + 2 * Nc * 4
                        + M * Nc * jnp.dtype(out_dtype).itemsize),
    )

    return pl.pallas_call(
        _matmul_bn_relu_kernel,
        out_shape=jax.ShapeDtypeStruct((M, Nc), out_dtype),
        grid=(grid_m,),
        in_specs=[
            pl.BlockSpec((tile_m, K), lambda i: (i, 0)),   # x rows: tiled over M
            pl.BlockSpec((K, Nc), lambda i: (0, 0)),       # weights: resident
            pl.BlockSpec((1, Nc), lambda i: (0, 0)),       # BN scale: resident
            pl.BlockSpec((1, Nc), lambda i: (0, 0)),       # BN bias:  resident
        ],
        out_specs=pl.BlockSpec((tile_m, Nc), lambda i: (i, 0)),
        compiler_params=pltpu.CompilerParams(
            dimension_semantics=("parallel",),             # megacore split on v7x
            vmem_limit_bytes=48 * 1024 * 1024,             # above 16/32 MiB defaults
        ),
        cost_estimate=cost,
    )(x2d, w2d, scale_row, bias_row)


def _deconv2_bn_relu_pixelrows(x2d, N, H, W, params, out_dtype):
    """One deconv2 layer operating on NHWC pixel rows (N*H*W, Cin) -> (N*2H*2W, Cout)."""
    w, gamma, beta, rmean, rvar = params          # w: (Cin, Cout, 2, 2)
    Cin, Cout = w.shape[0], w.shape[1]
    Nc = Cout * 4

    # Fold inference-mode BatchNorm (eps=1e-5, PyTorch default) into per-channel
    # scale/bias; repeat per 2x2 tap (tap-major within channel, matching w2d).
    inv_std = 1.0 / jnp.sqrt(rvar + 1e-5)
    scale_c = gamma * inv_std
    bias_c = beta - rmean * scale_c
    scale_row = jnp.repeat(scale_c, 4)[None, :].astype(jnp.float32)   # (1, Cout*4)
    bias_row = jnp.repeat(bias_c, 4)[None, :].astype(jnp.float32)
    w2d = w.reshape(Cin, Nc)                                          # (Cin, Cout*4)

    # Lane-dense output columns: pad Nc up to a multiple of 128 with zero
    # weight/scale/bias columns (padded outputs are exactly 0, sliced off below).
    nc_pad = pl.cdiv(Nc, _LANE) * _LANE
    pad = nc_pad - Nc
    if pad:
        w2d = jnp.pad(w2d, ((0, 0), (0, pad)))
        scale_row = jnp.pad(scale_row, ((0, 0), (0, pad)))
        bias_row = jnp.pad(bias_row, ((0, 0), (0, pad)))

    # bf16 MXU operands, f32 accumulation + epilogue inside the kernel.
    # TODO(synk): for Cin < ~64 the MXU contraction rows are mostly idle; a VPU
    # outer-product-accumulate variant would beat the MXU path at tiny K.
    x_bf = x2d.astype(jnp.bfloat16)
    w_bf = w2d.astype(jnp.bfloat16)

    z = _matmul_bn_relu(x_bf, w_bf, scale_row, bias_row, out_dtype)   # (M, nc_pad)
    z = z[:, :Nc]

    # Scatter the 2x2 taps onto the 2x-upsampled grid, staying in NHWC pixel rows:
    # y[n, 2i+di, 2j+dj, o] = z[(n,i,j), (o,di,dj)]
    z = z.reshape(N, H, W, Cout, 2, 2)
    y = jnp.transpose(z, (0, 1, 4, 2, 5, 3)).reshape(N * 2 * H * 2 * W, Cout)
    return y


def decoder_forward(x_nchw, params):
    """Decoder.forward ('deconv2' variant): layer1..layer4 applied in sequence."""
    N, C, H, W = x_nchw.shape
    # Enter NHWC pixel-row form once; stay there between layers (no per-layer
    # NCHW round trips); convert back to NCHW once at the end.
    x2d = jnp.transpose(x_nchw, (0, 2, 3, 1)).reshape(N * H * W, C)
    h, w_sp = H, W
    n_layers = len(params)
    for li, p in enumerate(params):
        out_dtype = jnp.float32 if li == n_layers - 1 else jnp.bfloat16
        x2d = _deconv2_bn_relu_pixelrows(x2d, N, h, w_sp, p, out_dtype)
        h, w_sp = 2 * h, 2 * w_sp
    c_out = params[-1][0].shape[1]
    y = x2d.reshape(N, h, w_sp, c_out)
    return jnp.transpose(y, (0, 3, 1, 2))


def init_decoder_params(key, in_channels):
    """Deterministic synthetic parameters for 4 deconv2 layers (C halves each time)."""
    params = []
    c = in_channels
    for _ in range(4):
        cout = c // 2
        key, kw, kg, kb, km, kv = jax.random.split(key, 6)
        fan_in = c * 2 * 2
        bound = 1.0 / math.sqrt(fan_in)
        w = jax.random.uniform(kw, (c, cout, 2, 2), jnp.float32, -bound, bound)
        gamma = jax.random.uniform(kg, (cout,), jnp.float32, 0.5, 1.5)
        beta = jax.random.uniform(kb, (cout,), jnp.float32, -0.1, 0.1)
        rmean = jax.random.uniform(km, (cout,), jnp.float32, -0.1, 0.1)
        rvar = jax.random.uniform(kv, (cout,), jnp.float32, 0.5, 1.5)
        params.append((w, gamma, beta, rmean, rvar))
        c = cout
    return params


def decoder_reference(x, params, compute_dtype=jnp.float32):
    """Pure-jnp reference.  compute_dtype=bf16 mirrors the kernel's operand rounding."""
    for (w, gamma, beta, rmean, rvar) in params:
        N, C, H, W = x.shape
        Cout = w.shape[1]
        z = jnp.einsum('nchw,codk->nohdwk',
                       x.astype(compute_dtype), w.astype(compute_dtype),
                       preferred_element_type=jnp.float32)     # ConvTranspose k=2,s=2
        y = z.reshape(N, Cout, 2 * H, 2 * W)
        inv_std = 1.0 / jnp.sqrt(rvar + 1e-5)
        scale = gamma * inv_std
        bias = beta - rmean * scale
        y = y * scale[None, :, None, None] + bias[None, :, None, None]
        x = jnp.maximum(y, 0.0)
    return x


if __name__ == "__main__":
    key = jax.random.PRNGKey(0)
    k_x, k_p = jax.random.split(key)

    # Small shapes consistent with a 4-stage halving decoder: C must be /16.
    N, C, H, W = 2, 32, 4, 4
    x = jax.random.normal(k_x, (N, C, H, W), jnp.float32)
    params = init_decoder_params(k_p, C)

    fwd = jax.jit(decoder_forward)
    out = jax.block_until_ready(fwd(x, params))

    assert out.shape == (N, C // 16, H * 16, W * 16), out.shape
    assert out.dtype == jnp.float32, out.dtype

    # Tight check vs a reference that applies the same bf16 operand rounding.
    ref_bf16 = decoder_reference(x, params, compute_dtype=jnp.bfloat16)
    assert jnp.allclose(out, ref_bf16, atol=2e-3, rtol=2e-3), "mismatch vs bf16-matched ref"

    # Loose check vs the full-f32 PyTorch-semantics reference.
    ref_f32 = decoder_reference(x, params, compute_dtype=jnp.float32)
    assert jnp.allclose(out, ref_f32, atol=5e-2, rtol=5e-2), "mismatch vs f32 reference"

    print("KERNEL_OK")
</pallas_src>

<mosaic_0001>
module attributes {stable_mosaic.version = 11 : i64} {
  func.func @_matmul_bn_relu_kernel(%arg0: i32, %arg1: memref<32x32xbf16, #tpu.memory_space<vmem>>, %arg2: memref<32x128xbf16, #tpu.memory_space<vmem>>, %arg3: memref<1x128xf32, #tpu.memory_space<vmem>>, %arg4: memref<1x128xf32, #tpu.memory_space<vmem>>, %arg5: memref<32x128xbf16, #tpu.memory_space<vmem>>) attributes {dimension_semantics = [#tpu.dimension_semantics<parallel>], iteration_bounds = array<i64: 1>, scalar_prefetch = 0 : i64, scratch_operands = 0 : i64, tpu.core_type = #tpu.core_type<tc>, window_params = [{transform_indices = @transform_0, window_bounds = array<i64: 32, 32>}, {pipeline_mode = #tpu.pipeline_mode<synchronous>, transform_indices = @transform_1, window_bounds = array<i64: 32, 128>}, {pipeline_mode = #tpu.pipeline_mode<synchronous>, transform_indices = @transform_2, window_bounds = array<i64: 1, 128>}, {pipeline_mode = #tpu.pipeline_mode<synchronous>, transform_indices = @transform_3, window_bounds = array<i64: 1, 128>}, {transform_indices = @transform_4, window_bounds = array<i64: 32, 128>}]} {
    %c0 = arith.constant 0 : index
    %c0_0 = arith.constant 0 : index
    %0 = vector.load %arg1[%c0, %c0_0] : memref<32x32xbf16, #tpu.memory_space<vmem>>, vector<32x32xbf16>
    %c0_1 = arith.constant 0 : index
    %c0_2 = arith.constant 0 : index
    %1 = vector.load %arg2[%c0_1, %c0_2] : memref<32x128xbf16, #tpu.memory_space<vmem>>, vector<32x128xbf16>
    %cst = arith.constant dense<0.000000e+00> : vector<32x128xf32>
    %2 = tpu.matmul %0, %1, %cst {dimension_numbers = #tpu.dot_dimension_numbers<[1], [0], [0], [1], [0, 0, 1, 1], [], []>} : vector<32x32xbf16>, vector<32x128xbf16>, vector<32x128xf32> -> vector<32x128xf32>
    %c0_3 = arith.constant 0 : index
    %c0_4 = arith.constant 0 : index
    %3 = vector.load %arg3[%c0_3, %c0_4] : memref<1x128xf32, #tpu.memory_space<vmem>>, vector<1x128xf32>
    %4 = vector.broadcast %3 : vector<1x128xf32> to vector<32x128xf32>
    %5 = arith.mulf %2, %4 : vector<32x128xf32>
    %c0_5 = arith.constant 0 : index
    %c0_6 = arith.constant 0 : index
    %6 = vector.load %arg4[%c0_5, %c0_6] : memref<1x128xf32, #tpu.memory_space<vmem>>, vector<1x128xf32>
    %7 = vector.broadcast %6 : vector<1x128xf32> to vector<32x128xf32>
    %8 = arith.addf %5, %7 : vector<32x128xf32>
    %cst_7 = arith.constant 0.000000e+00 : f32
    %9 = vector.broadcast %cst_7 : f32 to vector<32x128xf32>
    %10 = arith.maximumf %8, %9 : vector<32x128xf32>
    %11 = arith.truncf %10 : vector<32x128xf32> to vector<32x128xbf16>
    %c0_8 = arith.constant 0 : index
    %c0_9 = arith.constant 0 : index
    %12 = vector.load %arg5[%c0_8, %c0_9] : memref<32x128xbf16, #tpu.memory_space<vmem>>, vector<32x128xbf16>
    tpu.vector_store %arg5[%c0_8, %c0_9], %11 {strides = array<i32>} : memref<32x128xbf16, #tpu.memory_space<vmem>>, vector<32x128xbf16>,
    return
  }
  func.func @transform_0(%arg0: i32) -> (i32, i32) {
    %c0_i32 = arith.constant 0 : i32
    %c0_i32_0 = arith.constant 0 : i32
    return %arg0, %c0_i32 : i32, i32
  }
  func.func @transform_1(%arg0: i32) -> (i32, i32) {
    %c0_i32 = arith.constant 0 : i32
    %c0_i32_0 = arith.constant 0 : i32
    %c0_i32_1 = arith.constant 0 : i32
    return %c0_i32, %c0_i32_0 : i32, i32
  }
  func.func @transform_2(%arg0: i32) -> (i32, i32) {
    %c0_i32 = arith.constant 0 : i32
    %c0_i32_0 = arith.constant 0 : i32
    %c0_i32_1 = arith.constant 0 : i32
    return %c0_i32, %c0_i32_0 : i32, i32
  }
  func.func @transform_3(%arg0: i32) -> (i32, i32) {
    %c0_i32 = arith.constant 0 : i32
    %c0_i32_0 = arith.constant 0 : i32
    %c0_i32_1 = arith.constant 0 : i32
    return %c0_i32, %c0_i32_0 : i32, i32
  }
  func.func @transform_4(%arg0: i32) -> (i32, i32) {
    %c0_i32 = arith.constant 0 : i32
    %c0_i32_0 = arith.constant 0 : i32
    return %arg0, %c0_i32 : i32, i32
  }
}

module attributes {stable_mosaic.version = 11 : i64} {
  func.func @_matmul_bn_relu_kernel(%arg0: i32, %arg1: memref<128x16xbf16, #tpu.memory_space<vmem>>, %arg2: memref<16x128xbf16, #tpu.memory_space<vmem>>, %arg3: memref<1x128xf32, #tpu.memory_space<vmem>>, %arg4: memref<1x128xf32, #tpu.memory_space<vmem>>, %arg5: memref<128x128xbf16, #tpu.memory_space<vmem>>) attributes {dimension_semantics = [#tpu.dimension_semantics<parallel>], iteration_bounds = array<i64: 1>, scalar_prefetch = 0 : i64, scratch_operands = 0 : i64, tpu.core_type = #tpu.core_type<tc>, window_params = [{transform_indices = @transform_0, window_bounds = array<i64: 128, 16>}, {pipeline_mode = #tpu.pipeline_mode<synchronous>, transform_indices = @transform_1, window_bounds = array<i64: 16, 128>}, {pipeline_mode = #tpu.pipeline_mode<synchronous>, transform_indices = @transform_2, window_bounds = array<i64: 1, 128>}, {pipeline_mode = #tpu.pipeline_mode<synchronous>, transform_indices = @transform_3, window_bounds = array<i64: 1, 128>}, {transform_indices = @transform_4, window_bounds = array<i64: 128, 128>}]} {
    %c0 = arith.constant 0 : index
    %c0_0 = arith.constant 0 : index
    %0 = vector.load %arg1[%c0, %c0_0] : memref<128x16xbf16, #tpu.memory_space<vmem>>, vector<128x16xbf16>
    %c0_1 = arith.constant 0 : index
    %c0_2 = arith.constant 0 : index
    %1 = vector.load %arg2[%c0_1, %c0_2] : memref<16x128xbf16, #tpu.memory_space<vmem>>, vector<16x128xbf16>
    %cst = arith.constant dense<0.000000e+00> : vector<128x128xf32>
    %2 = tpu.matmul %0, %1, %cst {dimension_numbers = #tpu.dot_dimension_numbers<[1], [0], [0], [1], [0, 0, 1, 1], [], []>} : vector<128x16xbf16>, vector<16x128xbf16>, vector<128x128xf32> -> vector<128x128xf32>
    %c0_3 = arith.constant 0 : index
    %c0_4 = arith.constant 0 : index
    %3 = vector.load %arg3[%c0_3, %c0_4] : memref<1x128xf32, #tpu.memory_space<vmem>>, vector<1x128xf32>
    %4 = vector.broadcast %3 : vector<1x128xf32> to vector<128x128xf32>
    %5 = arith.mulf %2, %4 : vector<128x128xf32>
    %c0_5 = arith.constant 0 : index
    %c0_6 = arith.constant 0 : index
    %6 = vector.load %arg4[%c0_5, %c0_6] : memref<1x128xf32, #tpu.memory_space<vmem>>, vector<1x128xf32>
    %7 = vector.broadcast %6 : vector<1x128xf32> to vector<128x128xf32>
    %8 = arith.addf %5, %7 : vector<128x128xf32>
    %cst_7 = arith.constant 0.000000e+00 : f32
    %9 = vector.broadcast %cst_7 : f32 to vector<128x128xf32>
    %10 = arith.maximumf %8, %9 : vector<128x128xf32>
    %11 = arith.truncf %10 : vector<128x128xf32> to vector<128x128xbf16>
    %c0_8 = arith.constant 0 : index
    %c0_9 = arith.constant 0 : index
    %12 = vector.load %arg5[%c0_8, %c0_9] : memref<128x128xbf16, #tpu.memory_space<vmem>>, vector<128x128xbf16>
    tpu.vector_store %arg5[%c0_8, %c0_9], %11 {strides = array<i32>} : memref<128x128xbf16, #tpu.memory_space<vmem>>, vector<128x128xbf16>,
    return
  }
  func.func @transform_0(%arg0: i32) -> (i32, i32) {
    %c0_i32 = arith.constant 0 : i32
    %c0_i32_0 = arith.constant 0 : i32
    return %arg0, %c0_i32 : i32, i32
  }
  func.func @transform_1(%arg0: i32) -> (i32, i32) {
    %c0_i32 = arith.constant 0 : i32
    %c0_i32_0 = arith.constant 0 : i32
    %c0_i32_1 = arith.constant 0 : i32
    return %c0_i32, %c0_i32_0 : i32, i32
  }
  func.func @transform_2(%arg0: i32) -> (i32, i32) {
    %c0_i32 = arith.constant 0 : i32
    %c0_i32_0 = arith.constant 0 : i32
    %c0_i32_1 = arith.constant 0 : i32
    return %c0_i32, %c0_i32_0 : i32, i32
  }
  func.func @transform_3(%arg0: i32) -> (i32, i32) {
    %c0_i32 = arith.constant 0 : i32
    %c0_i32_0 = arith.constant 0 : i32
    %c0_i32_1 = arith.constant 0 : i32
    return %c0_i32, %c0_i32_0 : i32, i32
  }
  func.func @transform_4(%arg0: i32) -> (i32, i32) {
    %c0_i32 = arith.constant 0 : i32
    %c0_i32_0 = arith.constant 0 : i32
    return %arg0, %c0_i32 : i32, i32
  }
}

module attributes {stable_mosaic.version = 11 : i64} {
  func.func @_matmul_bn_relu_kernel(%arg0: i32, %arg1: memref<512x8xbf16, #tpu.memory_space<vmem>>, %arg2: memref<8x128xbf16, #tpu.memory_space<vmem>>, %arg3: memref<1x128xf32, #tpu.memory_space<vmem>>, %arg4: memref<1x128xf32, #tpu.memory_space<vmem>>, %arg5: memref<512x128xbf16, #tpu.memory_space<vmem>>) attributes {dimension_semantics = [#tpu.dimension_semantics<parallel>], iteration_bounds = array<i64: 1>, scalar_prefetch = 0 : i64, scratch_operands = 0 : i64, tpu.core_type = #tpu.core_type<tc>, window_params = [{transform_indices = @transform_0, window_bounds = array<i64: 512, 8>}, {pipeline_mode = #tpu.pipeline_mode<synchronous>, transform_indices = @transform_1, window_bounds = array<i64: 8, 128>}, {pipeline_mode = #tpu.pipeline_mode<synchronous>, transform_indices = @transform_2, window_bounds = array<i64: 1, 128>}, {pipeline_mode = #tpu.pipeline_mode<synchronous>, transform_indices = @transform_3, window_bounds = array<i64: 1, 128>}, {transform_indices = @transform_4, window_bounds = array<i64: 512, 128>}]} {
    %c0 = arith.constant 0 : index
    %c0_0 = arith.constant 0 : index
    %0 = vector.load %arg1[%c0, %c0_0] : memref<512x8xbf16, #tpu.memory_space<vmem>>, vector<512x8xbf16>
    %c0_1 = arith.constant 0 : index
    %c0_2 = arith.constant 0 : index
    %1 = vector.load %arg2[%c0_1, %c0_2] : memref<8x128xbf16, #tpu.memory_space<vmem>>, vector<8x128xbf16>
    %cst = arith.constant dense<0.000000e+00> : vector<512x128xf32>
    %2 = tpu.matmul %0, %1, %cst {dimension_numbers = #tpu.dot_dimension_numbers<[1], [0], [0], [1], [0, 0, 1, 1], [], []>} : vector<512x8xbf16>, vector<8x128xbf16>, vector<512x128xf32> -> vector<512x128xf32>
    %c0_3 = arith.constant 0 : index
    %c0_4 = arith.constant 0 : index
    %3 = vector.load %arg3[%c0_3, %c0_4] : memref<1x128xf32, #tpu.memory_space<vmem>>, vector<1x128xf32>
    %4 = vector.broadcast %3 : vector<1x128xf32> to vector<512x128xf32>
    %5 = arith.mulf %2, %4 : vector<512x128xf32>
    %c0_5 = arith.constant 0 : index
    %c0_6 = arith.constant 0 : index
    %6 = vector.load %arg4[%c0_5, %c0_6] : memref<1x128xf32, #tpu.memory_space<vmem>>, vector<1x128xf32>
    %7 = vector.broadcast %6 : vector<1x128xf32> to vector<512x128xf32>
    %8 = arith.addf %5, %7 : vector<512x128xf32>
    %cst_7 = arith.constant 0.000000e+00 : f32
    %9 = vector.broadcast %cst_7 : f32 to vector<512x128xf32>
    %10 = arith.maximumf %8, %9 : vector<512x128xf32>
    %11 = arith.truncf %10 : vector<512x128xf32> to vector<512x128xbf16>
    %c0_8 = arith.constant 0 : index
    %c0_9 = arith.constant 0 : index
    %12 = vector.load %arg5[%c0_8, %c0_9] : memref<512x128xbf16, #tpu.memory_space<vmem>>, vector<512x128xbf16>
    tpu.vector_store %arg5[%c0_8, %c0_9], %11 {strides = array<i32>} : memref<512x128xbf16, #tpu.memory_space<vmem>>, vector<512x128xbf16>,
    return
  }
  func.func @transform_0(%arg0: i32) -> (i32, i32) {
    %c0_i32 = arith.constant 0 : i32
    %c0_i32_0 = arith.constant 0 : i32
    return %arg0, %c0_i32 : i32, i32
  }
  func.func @transform_1(%arg0: i32) -> (i32, i32) {
    %c0_i32 = arith.constant 0 : i32
    %c0_i32_0 = arith.constant 0 : i32
    %c0_i32_1 = arith.constant 0 : i32
    return %c0_i32, %c0_i32_0 : i32, i32
  }
  func.func @transform_2(%arg0: i32) -> (i32, i32) {
    %c0_i32 = arith.constant 0 : i32
    %c0_i32_0 = arith.constant 0 : i32
    %c0_i32_1 = arith.constant 0 : i32
    return %c0_i32, %c0_i32_0 : i32, i32
  }
  func.func @transform_3(%arg0: i32) -> (i32, i32) {
    %c0_i32 = arith.constant 0 : i32
    %c0_i32_0 = arith.constant 0 : i32
    %c0_i32_1 = arith.constant 0 : i32
    return %c0_i32, %c0_i32_0 : i32, i32
  }
  func.func @transform_4(%arg0: i32) -> (i32, i32) {
    %c0_i32 = arith.constant 0 : i32
    %c0_i32_0 = arith.constant 0 : i32
    return %arg0, %c0_i32 : i32, i32
  }
}

module attributes {stable_mosaic.version = 11 : i64} {
  func.func @_matmul_bn_relu_kernel(%arg0: i32, %arg1: memref<512x4xbf16, #tpu.memory_space<vmem>>, %arg2: memref<4x128xbf16, #tpu.memory_space<vmem>>, %arg3: memref<1x128xf32, #tpu.memory_space<vmem>>, %arg4: memref<1x128xf32, #tpu.memory_space<vmem>>, %arg5: memref<512x128xf32, #tpu.memory_space<vmem>>) attributes {dimension_semantics = [#tpu.dimension_semantics<parallel>], iteration_bounds = array<i64: 4>, scalar_prefetch = 0 : i64, scratch_operands = 0 : i64, tpu.core_type = #tpu.core_type<tc>, window_params = [{transform_indices = @transform_0, window_bounds = array<i64: 512, 4>}, {pipeline_mode = #tpu.pipeline_mode<synchronous>, transform_indices = @transform_1, window_bounds = array<i64: 4, 128>}, {pipeline_mode = #tpu.pipeline_mode<synchronous>, transform_indices = @transform_2, window_bounds = array<i64: 1, 128>}, {pipeline_mode = #tpu.pipeline_mode<synchronous>, transform_indices = @transform_3, window_bounds = array<i64: 1, 128>}, {transform_indices = @transform_4, window_bounds = array<i64: 512, 128>}]} {
    %c0 = arith.constant 0 : index
    %c0_0 = arith.constant 0 : index
    %0 = vector.load %arg1[%c0, %c0_0] : memref<512x4xbf16, #tpu.memory_space<vmem>>, vector<512x4xbf16>
    %c0_1 = arith.constant 0 : index
    %c0_2 = arith.constant 0 : index
    %1 = vector.load %arg2[%c0_1, %c0_2] : memref<4x128xbf16, #tpu.memory_space<vmem>>, vector<4x128xbf16>
    %cst = arith.constant dense<0.000000e+00> : vector<512x128xf32>
    %2 = tpu.matmul %0, %1, %cst {dimension_numbers = #tpu.dot_dimension_numbers<[1], [0], [0], [1], [0, 0, 1, 1], [], []>} : vector<512x4xbf16>, vector<4x128xbf16>, vector<512x128xf32> -> vector<512x128xf32>
    %c0_3 = arith.constant 0 : index
    %c0_4 = arith.constant 0 : index
    %3 = vector.load %arg3[%c0_3, %c0_4] : memref<1x128xf32, #tpu.memory_space<vmem>>, vector<1x128xf32>
    %4 = vector.broadcast %3 : vector<1x128xf32> to vector<512x128xf32>
    %5 = arith.mulf %2, %4 : vector<512x128xf32>
    %c0_5 = arith.constant 0 : index
    %c0_6 = arith.constant 0 : index
    %6 = vector.load %arg4[%c0_5, %c0_6] : memref<1x128xf32, #tpu.memory_space<vmem>>, vector<1x128xf32>
    %7 = vector.broadcast %6 : vector<1x128xf32> to vector<512x128xf32>
    %8 = arith.addf %5, %7 : vector<512x128xf32>
    %cst_7 = arith.constant 0.000000e+00 : f32
    %9 = vector.broadcast %cst_7 : f32 to vector<512x128xf32>
    %10 = arith.maximumf %8, %9 : vector<512x128xf32>
    %c0_8 = arith.constant 0 : index
    %c0_9 = arith.constant 0 : index
    %11 = vector.load %arg5[%c0_8, %c0_9] : memref<512x128xf32, #tpu.memory_space<vmem>>, vector<512x128xf32>
    tpu.vector_store %arg5[%c0_8, %c0_9], %10 {strides = array<i32>} : memref<512x128xf32, #tpu.memory_space<vmem>>, vector<512x128xf32>,
    return
  }
  func.func @transform_0(%arg0: i32) -> (i32, i32) {
    %c0_i32 = arith.constant 0 : i32
    %c0_i32_0 = arith.constant 0 : i32
    return %arg0, %c0_i32 : i32, i32
  }
  func.func @transform_1(%arg0: i32) -> (i32, i32) {
    %c0_i32 = arith.constant 0 : i32
    %c0_i32_0 = arith.constant 0 : i32
    %c0_i32_1 = arith.constant 0 : i32
    return %c0_i32, %c0_i32_0 : i32, i32
  }
  func.func @transform_2(%arg0: i32) -> (i32, i32) {
    %c0_i32 = arith.constant 0 : i32
    %c0_i32_0 = arith.constant 0 : i32
    %c0_i32_1 = arith.constant 0 : i32
    return %c0_i32, %c0_i32_0 : i32, i32
  }
  func.func @transform_3(%arg0: i32) -> (i32, i32) {
    %c0_i32 = arith.constant 0 : i32
    %c0_i32_0 = arith.constant 0 : i32
    %c0_i32_1 = arith.constant 0 : i32
    return %c0_i32, %c0_i32_0 : i32, i32
  }
  func.func @transform_4(%arg0: i32) -> (i32, i32) {
    %c0_i32 = arith.constant 0 : i32
    %c0_i32_0 = arith.constant 0 : i32
    return %arg0, %c0_i32 : i32, i32
  }
}

</mosaic_0001>

<bundles_post_ra>
// kernel: decoder_forward.4
= control target key start
LH: loop header
LB: loop body
LE: loop exit
PB: predicated region body
PF: predicated region fallthrough
CT: control target
= control target key end

     0   :  { %vm48_vm0 = vcmask 261120   ;;  %s192_s1 = inlined_call_operand.vmem [shape: bf16[32,128], index: 1, kind: input, shape index: {}]   ;;  %s193_s2 = inlined_call_operand.vmem [shape: f32[1,128], index: 2, kind: input, shape index: {}]   ;;  %s194_s3 = inlined_call_operand.vmem [shape: f32[1,128], index: 3, kind: input, shape index: {}]   ;;  %s195_s0 = inlined_call_operand.vmem [shape: bf16[32,32], index: 0, kind: input, shape index: {}]   ;;  %s196_s4 = inlined_call_operand.vmem [shape: bf16[32,128], index: 4, kind: output, shape index: {}]  }
   0x1   :  { %v127_v0 = vld [vmem:[%s192_s1 + $0x8] sm:$0xff]  ;;  %v126_v1 = vld [vmem:[%s192_s1] sm:$0xff] }
   0x2   :  { %61 = vmatpush.bf16.msra.mxu0 %v127_v0  ;;  %139 = vmatpush.bf16.msra.mxu1 %v127_v0  ;;  %v124_v2 = vld [vmem:[%s195_s0] sm:$0xff]  ;;  %v125_v3 = vld [vmem:[%s195_s0 + $0x8] sm:$0xff] }
   0x3   :  { %v141_v6 = vld [vmem:[%s193_s2] ss:$0 sm:$0xff] }
   0x4   :  { %v142_v8 = vld [vmem:[%s194_s3] ss:$0 sm:$0xff] }
   0x6   :  { %62 = vmatpush.bf16.msra.mxu0 %v126_v1  ;;  %140 = vmatpush.bf16.msra.mxu1 %v126_v1 }
   0x9   :  { %122 = vmatmul.msk.bf16.vlgmr.msra.gmra.mxu0 %vm48_vm0, %v124_v2  ;;  %123 = vmatmul.msk.bf16.vlgmr.msra.gmra.mxu1 %vm48_vm0, %v125_v3 }
  0x86   :  { %v64_v4 = vpop.f32.mrf.mxu0  ;;  %v69_v5 = vpop.f32.mrf.mxu1 }
  0x87   :  { %v78_v7 = vmul.f32 %v141_v6, %v64_v4  ;;  %v80_v9 = vmul.f32 %v141_v6, %v69_v5 }
  0x89   :  { %v86_v12 = vadd.f32 %v142_v8, %v78_v7  ;;  %v88_v13 = vadd.f32 %v142_v8, %v80_v9 }
  0x8b   :  { %v90_v18 = vmax.f32 %v86_v12, 0.0  ;;  %v92_v19 = vmax.f32 %v88_v13, 0.0 }
  0x8e   :  { %v66_v10 = vpop.f32.mrf.mxu0  ;;  %v71_v11 = vpop.f32.mrf.mxu1 }
  0x8f   :  { %v79_v14 = vmul.f32 %v141_v6, %v66_v10  ;;  %v81_v15 = vmul.f32 %v141_v6, %v71_v11 }
  0x91   :  { %v87_v16 = vadd.f32 %v142_v8, %v79_v14  ;;  %v89_v17 = vadd.f32 %v142_v8, %v81_v15 }
  0x93   :  { %v91_v20 = vmax.f32 %v87_v16, 0.0  ;;  %v93_v21 = vmax.f32 %v89_v17, 0.0 }
  0x95   :  { %v131_v22 = vpack.c.bf16 %v91_v20, %v90_v18  ;;  %v136_v23 = vpack.c.bf16 %v93_v21, %v92_v19 }
  0x97   :  { %132 = vst [vmem:[%s196_s4] sm:$0xff] %v131_v22  }
  0x98   :  { %138 = vst [vmem:[%s196_s4 + $0x8] sm:$0xff] %v136_v23  }

// kernel: decoder_forward.5
= control target key start
LH: loop header
LB: loop body
LE: loop exit
PB: predicated region body
PF: predicated region fallthrough
CT: control target
= control target key end

     0   :  { %vm82_vm0 = vcmask 130048   ;;  %s479_s1 = inlined_call_operand.vmem [shape: bf16[16,128], index: 1, kind: input, shape index: {}]   ;;  %s480_s0 = inlined_call_operand.vmem [shape: bf16[128,16], index: 0, kind: input, shape index: {}]   ;;  %s481_s2 = inlined_call_operand.vmem [shape: f32[1,128], index: 2, kind: input, shape index: {}]   ;;  %s482_s3 = inlined_call_operand.vmem [shape: f32[1,128], index: 3, kind: input, shape index: {}]   ;;  %s483_s4 = inlined_call_operand.vmem [shape: bf16[128,128], index: 4, kind: output, shape index: {}]  }
   0x1   :  { %v300_v0 = vld [vmem:[%s479_s1] sm:$0xff]  ;;  %v294_v2 = vld [vmem:[%s480_s0 + $0x10] sm:$0xff]  ;;  %v293_v5 = vld [vmem:[%s480_s0 + $0x8] sm:$0xff] }
   0x2   :  { %v292_v1 = vld [vmem:[%s480_s0] sm:$0xff]  ;;  %114 = vmatpush.bf16.msra.mxu0 %v300_v0  ;;  %348 = vmatpush.bf16.msra.mxu1 %v300_v0  ;;  %v298_v4 = vld [vmem:[%s480_s0 + $0x30] sm:$0xff]  ;;  %v295_v6 = vld [vmem:[%s480_s0 + $0x18] sm:$0xff] }
   0x3   :  { %v296_v3 = vld [vmem:[%s480_s0 + $0x20] sm:$0xff]  ;;  %349 = vmatpush.bf16.msra.mxu2 %v300_v0  ;;  %350 = vmatpush.bf16.msra.mxu3 %v300_v0  ;;  %v297_v7 = vld [vmem:[%s480_s0 + $0x28] sm:$0xff]  ;;  %v299_v8 = vld [vmem:[%s480_s0 + $0x38] sm:$0xff] }
   0x4   :  { %v416_v11 = vld [vmem:[%s481_s2] ss:$0 sm:$0xff] }
   0x5   :  { %284 = vmatmul.msk.bf16.vlgmr.msra.gmra.mxu0 %vm82_vm0, %v292_v1  ;;  %286 = vmatmul.msk.bf16.vlgmr.msra.gmra.mxu1 %vm82_vm0, %v294_v2  ;;  %v422_v13 = vld [vmem:[%s482_s3] ss:$0 sm:$0xff] }
   0x6   :  { %288 = vmatmul.msk.bf16.vlgmr.msra.gmra.mxu2 %vm82_vm0, %v296_v3  ;;  %290 = vmatmul.msk.bf16.vlgmr.msra.gmra.mxu3 %vm82_vm0, %v298_v4 }
  0x15   :  { %285 = vmatmul.msk.bf16.gmra.mxu0 %vm82_vm0, %v293_v5  ;;  %287 = vmatmul.msk.bf16.gmra.mxu1 %vm82_vm0, %v295_v6 }
  0x16   :  { %289 = vmatmul.msk.bf16.gmra.mxu2 %vm82_vm0, %v297_v7  ;;  %291 = vmatmul.msk.bf16.gmra.mxu3 %vm82_vm0, %v299_v8 }
  0x82   :  { %v116_v9 = vpop.f32.mrf.mxu0  ;;  %v126_v10 = vpop.f32.mrf.mxu1 }
  0x83   :  { %v160_v12 = vmul.f32 %v416_v11, %v116_v9  ;;  %v164_v14 = vmul.f32 %v416_v11, %v126_v10 }
  0x85   :  { %v180_v19 = vadd.f32 %v422_v13, %v160_v12  ;;  %v184_v20 = vadd.f32 %v422_v13, %v164_v14 }
  0x87   :  { %v196_v27 = vmax.f32 %v180_v19, 0.0  ;;  %v200_v28 = vmax.f32 %v184_v20, 0.0 }
  0x89   :  { %v136_v15 = vpop.f32.mrf.mxu2  ;;  %v146_v16 = vpop.f32.mrf.mxu3 }
  0x8a   :  { %v118_v17 = vpop.f32.mrf.mxu0  ;;  %v128_v18 = vpop.f32.mrf.mxu1  ;;  %v168_v25 = vmul.f32 %v416_v11, %v136_v15  ;;  %v172_v26 = vmul.f32 %v416_v11, %v146_v16 }
  0x8b   :  { %v161_v21 = vmul.f32 %v416_v11, %v118_v17  ;;  %v165_v22 = vmul.f32 %v416_v11, %v128_v18 }
  0x8c   :  { %v188_v35 = vadd.f32 %v422_v13, %v168_v25  ;;  %v192_v36 = vadd.f32 %v422_v13, %v172_v26 }
  0x8d   :  { %v181_v23 = vadd.f32 %v422_v13, %v161_v21  ;;  %v185_v24 = vadd.f32 %v422_v13, %v165_v22 }
  0x8e   :  { %v204_v43 = vmax.f32 %v188_v35, 0.0  ;;  %v208_v44 = vmax.f32 %v192_v36, 0.0 }
  0x8f   :  { %v197_v29 = vmax.f32 %v181_v23, 0.0  ;;  %v201_v30 = vmax.f32 %v185_v24, 0.0 }
  0x91   :  { %v304_v31 = vpack.c.bf16 %v197_v29, %v196_v27  ;;  %v314_v32 = vpack.c.bf16 %v201_v30, %v200_v28  ;;  %v138_v33 = vpop.f32.mrf.mxu2  ;;  %v148_v34 = vpop.f32.mrf.mxu3 }
  0x92   :  { %v169_v37 = vmul.f32 %v416_v11, %v138_v33  ;;  %v173_v38 = vmul.f32 %v416_v11, %v148_v34  ;;  %v121_v39 = vpop.f32.mrf.mxu0  ;;  %v131_v40 = vpop.f32.mrf.mxu1 }
  0x93   :  { %305 = vst [vmem:[%s483_s4] sm:$0xff] %v304_v31   ;;  %v162_v47 = vmul.f32 %v416_v11, %v121_v39  ;;  %v166_v48 = vmul.f32 %v416_v11, %v131_v40 }
  0x94   :  { %342 = vst [vmem:[%s483_s4 + $0x10] sm:$0xff] %v314_v32   ;;  %v189_v41 = vadd.f32 %v422_v13, %v169_v37  ;;  %v193_v42 = vadd.f32 %v422_v13, %v173_v38 }
  0x95   :  { %v182_v55 = vadd.f32 %v422_v13, %v162_v47  ;;  %v186_v56 = vadd.f32 %v422_v13, %v166_v48 }
  0x96   :  { %v205_v45 = vmax.f32 %v189_v41, 0.0  ;;  %v209_v46 = vmax.f32 %v193_v42, 0.0 }
  0x97   :  { %v198_v63 = vmax.f32 %v182_v55, 0.0  ;;  %v202_v0 = vmax.f32 %v186_v56, 0.0 }
  0x98   :  { %v324_v49 = vpack.c.bf16 %v205_v45, %v204_v43  ;;  %v334_v50 = vpack.c.bf16 %v209_v46, %v208_v44 }
  0x99   :  { %v141_v51 = vpop.f32.mrf.mxu2  ;;  %v151_v52 = vpop.f32.mrf.mxu3 }
  0x9a   :  { %344 = vst [vmem:[%s483_s4 + $0x20] sm:$0xff] %v324_v49   ;;  %v123_v53 = vpop.f32.mrf.mxu0  ;;  %v133_v54 = vpop.f32.mrf.mxu1  ;;  %v170_v61 = vmul.f32 %v416_v11, %v141_v51  ;;  %v174_v62 = vmul.f32 %v416_v11, %v151_v52 }
  0x9b   :  { %346 = vst [vmem:[%s483_s4 + $0x30] sm:$0xff] %v334_v50   ;;  %v163_v57 = vmul.f32 %v416_v11, %v123_v53  ;;  %v167_v58 = vmul.f32 %v416_v11, %v133_v54 }
  0x9c   :  { %v190_v7 = vadd.f32 %v422_v13, %v170_v61  ;;  %v194_v8 = vadd.f32 %v422_v13, %v174_v62 }
  0x9d   :  { %v183_v59 = vadd.f32 %v422_v13, %v163_v57  ;;  %v187_v60 = vadd.f32 %v422_v13, %v167_v58 }
  0x9e   :  { %v206_v15 = vmax.f32 %v190_v7, 0.0  ;;  %v210_v16 = vmax.f32 %v194_v8, 0.0 }
  0x9f   :  { %v199_v1 = vmax.f32 %v183_v59, 0.0  ;;  %v203_v2 = vmax.f32 %v187_v60, 0.0 }
  0xa1   :  { %v309_v3 = vpack.c.bf16 %v199_v1, %v198_v63  ;;  %v319_v4 = vpack.c.bf16 %v203_v2, %v202_v0  ;;  %v143_v5 = vpop.f32.mrf.mxu2  ;;  %v153_v6 = vpop.f32.mrf.mxu3 }
  0xa2   :  { %v171_v9 = vmul.f32 %v416_v11, %v143_v5  ;;  %v175_v10 = vmul.f32 %v416_v11, %v153_v6 }
  0xa3   :  { %341 = vst [vmem:[%s483_s4 + $0x8] sm:$0xff] %v309_v3  }
  0xa4   :  { %343 = vst [vmem:[%s483_s4 + $0x18] sm:$0xff] %v319_v4   ;;  %v191_v12 = vadd.f32 %v422_v13, %v171_v9  ;;  %v195_v14 = vadd.f32 %v422_v13, %v175_v10 }
  0xa6   :  { %v207_v17 = vmax.f32 %v191_v12, 0.0  ;;  %v211_v18 = vmax.f32 %v195_v14, 0.0 }
  0xa8   :  { %v329_v19 = vpack.c.bf16 %v207_v17, %v206_v15  ;;  %v339_v20 = vpack.c.bf16 %v211_v18, %v210_v16 }
  0xaa   :  { %345 = vst [vmem:[%s483_s4 + $0x28] sm:$0xff] %v329_v19  }
  0xab   :  { %347 = vst [vmem:[%s483_s4 + $0x38] sm:$0xff] %v339_v20  }

// kernel: decoder_forward.6
= control target key start
LH: loop header
LB: loop body
LE: loop exit
PB: predicated region body
PF: predicated region fallthrough
CT: control target
= control target key end

     0   :  { %vm340_vm0 = vcmask 1043456   ;;  %vm243_vm1 = vcmask 64512   ;;  %s1623_s1 = inlined_call_operand.vmem [shape: bf16[8,128], index: 1, kind: input, shape index: {}]   ;;  %s1624_s0 = inlined_call_operand.vmem [shape: bf16[512,8], index: 0, kind: input, shape index: {}]   ;;  %s1625_s2 = inlined_call_operand.vmem [shape: f32[1,128], index: 2, kind: input, shape index: {}]   ;;  %s1626_s3 = inlined_call_operand.vmem [shape: f32[1,128], index: 3, kind: input, shape index: {}]   ;;  %s1627_s4 = inlined_call_operand.vmem [shape: bf16[512,128], index: 4, kind: output, shape index: {}]  }
   0x1   :  { %v82_v0 = vld [vmem:[%s1623_s1] sm:$0xf]  ;;  %v1006_v6 = vld [vmem:[%s1624_s0 + $0x8] sm:$0xff]  ;;  %v1007_v10 = vld [vmem:[%s1624_s0 + $0x10] sm:$0xff] }
   0x2   :  { %v342_v1 = vsel %vm340_vm0, %v82_v0, 0  ;;  %v1005_v2 = vld [vmem:[%s1624_s0] sm:$0xff]  ;;  %v1014_v7 = vld [vmem:[%s1624_s0 + $0x48] sm:$0xff]  ;;  %v1015_v11 = vld [vmem:[%s1624_s0 + $0x50] sm:$0xff] }
   0x3   :  { %v1013_v3 = vld [vmem:[%s1624_s0 + $0x40] sm:$0xff]  ;;  %351 = vmatpush.bf16.msra.mxu0 %v342_v1  ;;  %1228 = vmatpush.bf16.msra.mxu1 %v342_v1  ;;  %v1022_v8 = vld [vmem:[%s1624_s0 + $0x88] sm:$0xff]  ;;  %v1023_v12 = vld [vmem:[%s1624_s0 + $0x90] sm:$0xff] }
   0x4   :  { %v1021_v4 = vld [vmem:[%s1624_s0 + $0x80] sm:$0xff]  ;;  %1229 = vmatpush.bf16.msra.mxu2 %v342_v1  ;;  %1230 = vmatpush.bf16.msra.mxu3 %v342_v1  ;;  %v1030_v9 = vld [vmem:[%s1624_s0 + $0xc8] sm:$0xff]  ;;  %v1031_v13 = vld [vmem:[%s1624_s0 + $0xd0] sm:$0xff] }
   0x5   :  { %v1029_v5 = vld [vmem:[%s1624_s0 + $0xc0] sm:$0xff]  ;;  %v1008_v14 = vld [vmem:[%s1624_s0 + $0x18] sm:$0xff]  ;;  %v1010_v22 = vld [vmem:[%s1624_s0 + $0x28] sm:$0xff] }
   0x6   :  { %973 = vmatmul.msk.bf16.vlgmr.msra.gmra.mxu0 %vm243_vm1, %v1005_v2  ;;  %981 = vmatmul.msk.bf16.vlgmr.msra.gmra.mxu1 %vm243_vm1, %v1013_v3  ;;  %v1016_v15 = vld [vmem:[%s1624_s0 + $0x58] sm:$0xff]  ;;  %v1009_v18 = vld [vmem:[%s1624_s0 + $0x20] sm:$0xff]  ;;  %v1018_v23 = vld [vmem:[%s1624_s0 + $0x68] sm:$0xff] }
   0x7   :  { %989 = vmatmul.msk.bf16.vlgmr.msra.gmra.mxu2 %vm243_vm1, %v1021_v4  ;;  %997 = vmatmul.msk.bf16.vlgmr.msra.gmra.mxu3 %vm243_vm1, %v1029_v5  ;;  %v1024_v16 = vld [vmem:[%s1624_s0 + $0x98] sm:$0xff]  ;;  %v1017_v19 = vld [vmem:[%s1624_s0 + $0x60] sm:$0xff]  ;;  %v1026_v24 = vld [vmem:[%s1624_s0 + $0xa8] sm:$0xff] }
   0x8   :  { %v1032_v17 = vld [vmem:[%s1624_s0 + $0xd8] sm:$0xff]  ;;  %v1025_v20 = vld [vmem:[%s1624_s0 + $0xa0] sm:$0xff]  ;;  %v1034_v25 = vld [vmem:[%s1624_s0 + $0xe8] sm:$0xff] }
   0x9   :  { %v1033_v21 = vld [vmem:[%s1624_s0 + $0xe0] sm:$0xff]  ;;  %v1011_v26 = vld [vmem:[%s1624_s0 + $0x30] sm:$0xff]  ;;  %v1012_v30 = vld [vmem:[%s1624_s0 + $0x38] sm:$0xff] }
   0xa   :  { %v1019_v27 = vld [vmem:[%s1624_s0 + $0x70] sm:$0xff]  ;;  %v1020_v31 = vld [vmem:[%s1624_s0 + $0x78] sm:$0xff]  ;;  %v1392_v36 = vld [vmem:[%s1625_s2] ss:$0 sm:$0xff] }
   0xb   :  { %v1027_v28 = vld [vmem:[%s1624_s0 + $0xb0] sm:$0xff]  ;;  %v1028_v32 = vld [vmem:[%s1624_s0 + $0xb8] sm:$0xff]  ;;  %v1398_v38 = vld [vmem:[%s1626_s3] ss:$0 sm:$0xff] }
   0xc   :  { %v1035_v29 = vld [vmem:[%s1624_s0 + $0xf0] sm:$0xff]  ;;  %v1036_v33 = vld [vmem:[%s1624_s0 + $0xf8] sm:$0xff] }
  0x16   :  { %974 = vmatmul.msk.bf16.gmra.mxu0 %vm243_vm1, %v1006_v6  ;;  %982 = vmatmul.msk.bf16.gmra.mxu1 %vm243_vm1, %v1014_v7 }
  0x17   :  { %990 = vmatmul.msk.bf16.gmra.mxu2 %vm243_vm1, %v1022_v8  ;;  %998 = vmatmul.msk.bf16.gmra.mxu3 %vm243_vm1, %v1030_v9 }
  0x26   :  { %975 = vmatmul.msk.bf16.gmra.mxu0 %vm243_vm1, %v1007_v10  ;;  %983 = vmatmul.msk.bf16.gmra.mxu1 %vm243_vm1, %v1015_v11 }
  0x27   :  { %991 = vmatmul.msk.bf16.gmra.mxu2 %vm243_vm1, %v1023_v12  ;;  %999 = vmatmul.msk.bf16.gmra.mxu3 %vm243_vm1, %v1031_v13 }
  0x36   :  { %976 = vmatmul.msk.bf16.gmra.mxu0 %vm243_vm1, %v1008_v14  ;;  %984 = vmatmul.msk.bf16.gmra.mxu1 %vm243_vm1, %v1016_v15 }
  0x37   :  { %992 = vmatmul.msk.bf16.gmra.mxu2 %vm243_vm1, %v1024_v16  ;;  %1000 = vmatmul.msk.bf16.gmra.mxu3 %vm243_vm1, %v1032_v17 }
  0x46   :  { %977 = vmatmul.msk.bf16.gmra.mxu0 %vm243_vm1, %v1009_v18  ;;  %985 = vmatmul.msk.bf16.gmra.mxu1 %vm243_vm1, %v1017_v19 }
  0x47   :  { %993 = vmatmul.msk.bf16.gmra.mxu2 %vm243_vm1, %v1025_v20  ;;  %1001 = vmatmul.msk.bf16.gmra.mxu3 %vm243_vm1, %v1033_v21 }
  0x56   :  { %978 = vmatmul.msk.bf16.gmra.mxu0 %vm243_vm1, %v1010_v22  ;;  %986 = vmatmul.msk.bf16.gmra.mxu1 %vm243_vm1, %v1018_v23 }
  0x57   :  { %994 = vmatmul.msk.bf16.gmra.mxu2 %vm243_vm1, %v1026_v24  ;;  %1002 = vmatmul.msk.bf16.gmra.mxu3 %vm243_vm1, %v1034_v25 }
  0x66   :  { %979 = vmatmul.msk.bf16.gmra.mxu0 %vm243_vm1, %v1011_v26  ;;  %987 = vmatmul.msk.bf16.gmra.mxu1 %vm243_vm1, %v1019_v27 }
  0x67   :  { %995 = vmatmul.msk.bf16.gmra.mxu2 %vm243_vm1, %v1027_v28  ;;  %1003 = vmatmul.msk.bf16.gmra.mxu3 %vm243_vm1, %v1035_v29 }
  0x76   :  { %980 = vmatmul.msk.bf16.gmra.mxu0 %vm243_vm1, %v1012_v30  ;;  %988 = vmatmul.msk.bf16.gmra.mxu1 %vm243_vm1, %v1020_v31 }
  0x77   :  { %996 = vmatmul.msk.bf16.gmra.mxu2 %vm243_vm1, %v1028_v32  ;;  %1004 = vmatmul.msk.bf16.gmra.mxu3 %vm243_vm1, %v1036_v33 }
  0x83   :  { %v353_v34 = vpop.f32.mrf.mxu0  ;;  %v393_v35 = vpop.f32.mrf.mxu1 }
  0x84   :  { %v517_v37 = vmul.f32 %v1392_v36, %v353_v34  ;;  %v533_v39 = vmul.f32 %v1392_v36, %v393_v35 }
  0x86   :  { %v585_v44 = vadd.f32 %v1398_v38, %v517_v37  ;;  %v601_v45 = vadd.f32 %v1398_v38, %v533_v39 }
  0x88   :  { %v649_v52 = vmax.f32 %v585_v44, 0.0  ;;  %v665_v53 = vmax.f32 %v601_v45, 0.0 }
  0x8a   :  { %v433_v40 = vpop.f32.mrf.mxu2  ;;  %v473_v41 = vpop.f32.mrf.mxu3 }
  0x8b   :  { %v355_v42 = vpop.f32.mrf.mxu0  ;;  %v395_v43 = vpop.f32.mrf.mxu1  ;;  %v549_v50 = vmul.f32 %v1392_v36, %v433_v40  ;;  %v565_v51 = vmul.f32 %v1392_v36, %v473_v41 }
  0x8c   :  { %v518_v46 = vmul.f32 %v1392_v36, %v355_v42  ;;  %v534_v47 = vmul.f32 %v1392_v36, %v395_v43 }
  0x8d   :  { %v617_v60 = vadd.f32 %v1398_v38, %v549_v50  ;;  %v633_v61 = vadd.f32 %v1398_v38, %v565_v51 }
  0x8e   :  { %v586_v48 = vadd.f32 %v1398_v38, %v518_v46  ;;  %v602_v49 = vadd.f32 %v1398_v38, %v534_v47 }
  0x8f   :  { %v681_v4 = vmax.f32 %v617_v60, 0.0  ;;  %v697_v5 = vmax.f32 %v633_v61, 0.0 }
  0x90   :  { %v650_v54 = vmax.f32 %v586_v48, 0.0  ;;  %v666_v55 = vmax.f32 %v602_v49, 0.0 }
  0x92   :  { %v1040_v56 = vpack.c.bf16 %v650_v54, %v649_v52  ;;  %v1080_v57 = vpack.c.bf16 %v666_v55, %v665_v53  ;;  %v435_v58 = vpop.f32.mrf.mxu2  ;;  %v475_v59 = vpop.f32.mrf.mxu3 }
  0x93   :  { %v550_v62 = vmul.f32 %v1392_v36, %v435_v58  ;;  %v566_v63 = vmul.f32 %v1392_v36, %v475_v59  ;;  %v358_v0 = vpop.f32.mrf.mxu0  ;;  %v398_v1 = vpop.f32.mrf.mxu1 }
  0x94   :  { %1041 = vst [vmem:[%s1627_s4] sm:$0xff] %v1040_v56   ;;  %v519_v8 = vmul.f32 %v1392_v36, %v358_v0  ;;  %v535_v9 = vmul.f32 %v1392_v36, %v398_v1 }
  0x95   :  { %1204 = vst [vmem:[%s1627_s4 + $0x40] sm:$0xff] %v1080_v57   ;;  %v618_v2 = vadd.f32 %v1398_v38, %v550_v62  ;;  %v634_v3 = vadd.f32 %v1398_v38, %v566_v63 }
  0x96   :  { %v587_v16 = vadd.f32 %v1398_v38, %v519_v8  ;;  %v603_v17 = vadd.f32 %v1398_v38, %v535_v9 }
  0x97   :  { %v682_v6 = vmax.f32 %v618_v2, 0.0  ;;  %v698_v7 = vmax.f32 %v634_v3, 0.0 }
  0x98   :  { %v651_v24 = vmax.f32 %v587_v16, 0.0  ;;  %v667_v25 = vmax.f32 %v603_v17, 0.0 }
  0x99   :  { %v1120_v10 = vpack.c.bf16 %v682_v6, %v681_v4  ;;  %v1160_v11 = vpack.c.bf16 %v698_v7, %v697_v5 }
  0x9a   :  { %v438_v12 = vpop.f32.mrf.mxu2  ;;  %v478_v13 = vpop.f32.mrf.mxu3 }
  0x9b   :  { %1212 = vst [vmem:[%s1627_s4 + $0x80] sm:$0xff] %v1120_v10   ;;  %v360_v14 = vpop.f32.mrf.mxu0  ;;  %v400_v15 = vpop.f32.mrf.mxu1  ;;  %v551_v22 = vmul.f32 %v1392_v36, %v438_v12  ;;  %v567_v23 = vmul.f32 %v1392_v36, %v478_v13 }
  0x9c   :  { %1220 = vst [vmem:[%s1627_s4 + $0xc0] sm:$0xff] %v1160_v11   ;;  %v520_v18 = vmul.f32 %v1392_v36, %v360_v14  ;;  %v536_v19 = vmul.f32 %v1392_v36, %v400_v15 }
  0x9d   :  { %v619_v32 = vadd.f32 %v1398_v38, %v551_v22  ;;  %v635_v33 = vadd.f32 %v1398_v38, %v567_v23 }
  0x9e   :  { %v588_v20 = vadd.f32 %v1398_v38, %v520_v18  ;;  %v604_v21 = vadd.f32 %v1398_v38, %v536_v19 }
  0x9f   :  { %v683_v42 = vmax.f32 %v619_v32, 0.0  ;;  %v699_v43 = vmax.f32 %v635_v33, 0.0 }
  0xa0   :  { %v652_v26 = vmax.f32 %v588_v20, 0.0  ;;  %v668_v27 = vmax.f32 %v604_v21, 0.0 }
  0xa2   :  { %v1045_v28 = vpack.c.bf16 %v652_v26, %v651_v24  ;;  %v1085_v29 = vpack.c.bf16 %v668_v27, %v667_v25  ;;  %v440_v30 = vpop.f32.mrf.mxu2  ;;  %v480_v31 = vpop.f32.mrf.mxu3 }
  0xa3   :  { %v552_v34 = vmul.f32 %v1392_v36, %v440_v30  ;;  %v568_v35 = vmul.f32 %v1392_v36, %v480_v31  ;;  %v363_v37 = vpop.f32.mrf.mxu0  ;;  %v403_v39 = vpop.f32.mrf.mxu1 }
  0xa4   :  { %1197 = vst [vmem:[%s1627_s4 + $0x8] sm:$0xff] %v1045_v28   ;;  %v521_v46 = vmul.f32 %v1392_v36, %v363_v37  ;;  %v537_v47 = vmul.f32 %v1392_v36, %v403_v39 }
  0xa5   :  { %1205 = vst [vmem:[%s1627_s4 + $0x48] sm:$0xff] %v1085_v29   ;;  %v620_v40 = vadd.f32 %v1398_v38, %v552_v34  ;;  %v636_v41 = vadd.f32 %v1398_v38, %v568_v35 }
  0xa6   :  { %v589_v54 = vadd.f32 %v1398_v38, %v521_v46  ;;  %v605_v55 = vadd.f32 %v1398_v38, %v537_v47 }
  0xa7   :  { %v684_v44 = vmax.f32 %v620_v40, 0.0  ;;  %v700_v45 = vmax.f32 %v636_v41, 0.0 }
  0xa8   :  { %v653_v62 = vmax.f32 %v589_v54, 0.0  ;;  %v669_v63 = vmax.f32 %v605_v55, 0.0 }
  0xa9   :  { %v1125_v48 = vpack.c.bf16 %v684_v44, %v683_v42  ;;  %v1165_v49 = vpack.c.bf16 %v700_v45, %v699_v43 }
  0xaa   :  { %v443_v50 = vpop.f32.mrf.mxu2  ;;  %v483_v51 = vpop.f32.mrf.mxu3 }
  0xab   :  { %1213 = vst [vmem:[%s1627_s4 + $0x88] sm:$0xff] %v1125_v48   ;;  %v365_v52 = vpop.f32.mrf.mxu0  ;;  %v405_v53 = vpop.f32.mrf.mxu1  ;;  %v553_v60 = vmul.f32 %v1392_v36, %v443_v50  ;;  %v569_v61 = vmul.f32 %v1392_v36, %v483_v51 }
  0xac   :  { %1221 = vst [vmem:[%s1627_s4 + $0xc8] sm:$0xff] %v1165_v49   ;;  %v522_v56 = vmul.f32 %v1392_v36, %v365_v52  ;;  %v538_v57 = vmul.f32 %v1392_v36, %v405_v53 }
  0xad   :  { %v621_v6 = vadd.f32 %v1398_v38, %v553_v60  ;;  %v637_v7 = vadd.f32 %v1398_v38, %v569_v61 }
  0xae   :  { %v590_v58 = vadd.f32 %v1398_v38, %v522_v56  ;;  %v606_v59 = vadd.f32 %v1398_v38, %v538_v57 }
  0xaf   :  { %v685_v14 = vmax.f32 %v621_v6, 0.0  ;;  %v701_v15 = vmax.f32 %v637_v7, 0.0 }
  0xb0   :  { %v654_v0 = vmax.f32 %v590_v58, 0.0  ;;  %v670_v1 = vmax.f32 %v606_v59, 0.0 }
  0xb2   :  { %v1050_v2 = vpack.c.bf16 %v654_v0, %v653_v62  ;;  %v1090_v3 = vpack.c.bf16 %v670_v1, %v669_v63  ;;  %v445_v4 = vpop.f32.mrf.mxu2  ;;  %v485_v5 = vpop.f32.mrf.mxu3 }
  0xb3   :  { %v554_v8 = vmul.f32 %v1392_v36, %v445_v4  ;;  %v570_v9 = vmul.f32 %v1392_v36, %v485_v5  ;;  %v368_v10 = vpop.f32.mrf.mxu0  ;;  %v408_v11 = vpop.f32.mrf.mxu1 }
  0xb4   :  { %1198 = vst [vmem:[%s1627_s4 + $0x10] sm:$0xff] %v1050_v2   ;;  %v523_v18 = vmul.f32 %v1392_v36, %v368_v10  ;;  %v539_v19 = vmul.f32 %v1392_v36, %v408_v11 }
  0xb5   :  { %1206 = vst [vmem:[%s1627_s4 + $0x50] sm:$0xff] %v1090_v3   ;;  %v622_v12 = vadd.f32 %v1398_v38, %v554_v8  ;;  %v638_v13 = vadd.f32 %v1398_v38, %v570_v9 }
  0xb6   :  { %v591_v26 = vadd.f32 %v1398_v38, %v523_v18  ;;  %v607_v27 = vadd.f32 %v1398_v38, %v539_v19 }
  0xb7   :  { %v686_v16 = vmax.f32 %v622_v12, 0.0  ;;  %v702_v17 = vmax.f32 %v638_v13, 0.0 }
  0xb8   :  { %v655_v34 = vmax.f32 %v591_v26, 0.0  ;;  %v671_v35 = vmax.f32 %v607_v27, 0.0 }
  0xb9   :  { %v1130_v20 = vpack.c.bf16 %v686_v16, %v685_v14  ;;  %v1170_v21 = vpack.c.bf16 %v702_v17, %v701_v15 }
  0xba   :  { %v448_v22 = vpop.f32.mrf.mxu2  ;;  %v488_v23 = vpop.f32.mrf.mxu3 }
  0xbb   :  { %1214 = vst [vmem:[%s1627_s4 + $0x90] sm:$0xff] %v1130_v20   ;;  %v370_v24 = vpop.f32.mrf.mxu0  ;;  %v410_v25 = vpop.f32.mrf.mxu1  ;;  %v555_v32 = vmul.f32 %v1392_v36, %v448_v22  ;;  %v571_v33 = vmul.f32 %v1392_v36, %v488_v23 }
  0xbc   :  { %1222 = vst [vmem:[%s1627_s4 + $0xd0] sm:$0xff] %v1170_v21   ;;  %v524_v28 = vmul.f32 %v1392_v36, %v370_v24  ;;  %v540_v29 = vmul.f32 %v1392_v36, %v410_v25 }
  0xbd   :  { %v623_v44 = vadd.f32 %v1398_v38, %v555_v32  ;;  %v639_v45 = vadd.f32 %v1398_v38, %v571_v33 }
  0xbe   :  { %v592_v30 = vadd.f32 %v1398_v38, %v524_v28  ;;  %v608_v31 = vadd.f32 %v1398_v38, %v540_v29 }
  0xbf   :  { %v687_v52 = vmax.f32 %v623_v44, 0.0  ;;  %v703_v53 = vmax.f32 %v639_v45, 0.0 }
  0xc0   :  { %v656_v37 = vmax.f32 %v592_v30, 0.0  ;;  %v672_v39 = vmax.f32 %v608_v31, 0.0 }
  0xc2   :  { %v1055_v40 = vpack.c.bf16 %v656_v37, %v655_v34  ;;  %v1095_v41 = vpack.c.bf16 %v672_v39, %v671_v35  ;;  %v450_v42 = vpop.f32.mrf.mxu2  ;;  %v490_v43 = vpop.f32.mrf.mxu3 }
  0xc3   :  { %v556_v46 = vmul.f32 %v1392_v36, %v450_v42  ;;  %v572_v47 = vmul.f32 %v1392_v36, %v490_v43  ;;  %v373_v48 = vpop.f32.mrf.mxu0  ;;  %v413_v49 = vpop.f32.mrf.mxu1 }
  0xc4   :  { %1199 = vst [vmem:[%s1627_s4 + $0x18] sm:$0xff] %v1055_v40   ;;  %v525_v56 = vmul.f32 %v1392_v36, %v373_v48  ;;  %v541_v57 = vmul.f32 %v1392_v36, %v413_v49 }
  0xc5   :  { %1207 = vst [vmem:[%s1627_s4 + $0x58] sm:$0xff] %v1095_v41   ;;  %v624_v50 = vadd.f32 %v1398_v38, %v556_v46  ;;  %v640_v51 = vadd.f32 %v1398_v38, %v572_v47 }
  0xc6   :  { %v593_v0 = vadd.f32 %v1398_v38, %v525_v56  ;;  %v609_v1 = vadd.f32 %v1398_v38, %v541_v57 }
  0xc7   :  { %v688_v54 = vmax.f32 %v624_v50, 0.0  ;;  %v704_v55 = vmax.f32 %v640_v51, 0.0 }
  0xc8   :  { %v657_v8 = vmax.f32 %v593_v0, 0.0  ;;  %v673_v9 = vmax.f32 %v609_v1, 0.0 }
  0xc9   :  { %v1135_v58 = vpack.c.bf16 %v688_v54, %v687_v52  ;;  %v1175_v59 = vpack.c.bf16 %v704_v55, %v703_v53 }
  0xca   :  { %v453_v60 = vpop.f32.mrf.mxu2  ;;  %v493_v61 = vpop.f32.mrf.mxu3 }
  0xcb   :  { %1215 = vst [vmem:[%s1627_s4 + $0x98] sm:$0xff] %v1135_v58   ;;  %v375_v62 = vpop.f32.mrf.mxu0  ;;  %v415_v63 = vpop.f32.mrf.mxu1  ;;  %v557_v6 = vmul.f32 %v1392_v36, %v453_v60  ;;  %v573_v7 = vmul.f32 %v1392_v36, %v493_v61 }
  0xcc   :  { %1223 = vst [vmem:[%s1627_s4 + $0xd8] sm:$0xff] %v1175_v59   ;;  %v526_v2 = vmul.f32 %v1392_v36, %v375_v62  ;;  %v542_v3 = vmul.f32 %v1392_v36, %v415_v63 }
  0xcd   :  { %v625_v16 = vadd.f32 %v1398_v38, %v557_v6  ;;  %v641_v17 = vadd.f32 %v1398_v38, %v573_v7 }
  0xce   :  { %v594_v4 = vadd.f32 %v1398_v38, %v526_v2  ;;  %v610_v5 = vadd.f32 %v1398_v38, %v542_v3 }
  0xcf   :  { %v689_v24 = vmax.f32 %v625_v16, 0.0  ;;  %v705_v25 = vmax.f32 %v641_v17, 0.0 }
  0xd0   :  { %v658_v10 = vmax.f32 %v594_v4, 0.0  ;;  %v674_v11 = vmax.f32 %v610_v5, 0.0 }
  0xd2   :  { %v1060_v12 = vpack.c.bf16 %v658_v10, %v657_v8  ;;  %v1100_v13 = vpack.c.bf16 %v674_v11, %v673_v9  ;;  %v455_v14 = vpop.f32.mrf.mxu2  ;;  %v495_v15 = vpop.f32.mrf.mxu3 }
  0xd3   :  { %v558_v18 = vmul.f32 %v1392_v36, %v455_v14  ;;  %v574_v19 = vmul.f32 %v1392_v36, %v495_v15  ;;  %v378_v20 = vpop.f32.mrf.mxu0  ;;  %v418_v21 = vpop.f32.mrf.mxu1 }
  0xd4   :  { %1200 = vst [vmem:[%s1627_s4 + $0x20] sm:$0xff] %v1060_v12   ;;  %v527_v28 = vmul.f32 %v1392_v36, %v378_v20  ;;  %v543_v29 = vmul.f32 %v1392_v36, %v418_v21 }
  0xd5   :  { %1208 = vst [vmem:[%s1627_s4 + $0x60] sm:$0xff] %v1100_v13   ;;  %v626_v22 = vadd.f32 %v1398_v38, %v558_v18  ;;  %v642_v23 = vadd.f32 %v1398_v38, %v574_v19 }
  0xd6   :  { %v595_v37 = vadd.f32 %v1398_v38, %v527_v28  ;;  %v611_v39 = vadd.f32 %v1398_v38, %v543_v29 }
  0xd7   :  { %v690_v26 = vmax.f32 %v626_v22, 0.0  ;;  %v706_v27 = vmax.f32 %v642_v23, 0.0 }
  0xd8   :  { %v659_v46 = vmax.f32 %v595_v37, 0.0  ;;  %v675_v47 = vmax.f32 %v611_v39, 0.0 }
  0xd9   :  { %v1140_v30 = vpack.c.bf16 %v690_v26, %v689_v24  ;;  %v1180_v31 = vpack.c.bf16 %v706_v27, %v705_v25 }
  0xda   :  { %v458_v32 = vpop.f32.mrf.mxu2  ;;  %v498_v33 = vpop.f32.mrf.mxu3 }
  0xdb   :  { %1216 = vst [vmem:[%s1627_s4 + $0xa0] sm:$0xff] %v1140_v30   ;;  %v380_v34 = vpop.f32.mrf.mxu0  ;;  %v420_v35 = vpop.f32.mrf.mxu1  ;;  %v559_v44 = vmul.f32 %v1392_v36, %v458_v32  ;;  %v575_v45 = vmul.f32 %v1392_v36, %v498_v33 }
  0xdc   :  { %1224 = vst [vmem:[%s1627_s4 + $0xe0] sm:$0xff] %v1180_v31   ;;  %v528_v40 = vmul.f32 %v1392_v36, %v380_v34  ;;  %v544_v41 = vmul.f32 %v1392_v36, %v420_v35 }
  0xdd   :  { %v627_v54 = vadd.f32 %v1398_v38, %v559_v44  ;;  %v643_v55 = vadd.f32 %v1398_v38, %v575_v45 }
  0xde   :  { %v596_v42 = vadd.f32 %v1398_v38, %v528_v40  ;;  %v612_v43 = vadd.f32 %v1398_v38, %v544_v41 }
  0xdf   :  { %v691_v62 = vmax.f32 %v627_v54, 0.0  ;;  %v707_v63 = vmax.f32 %v643_v55, 0.0 }
  0xe0   :  { %v660_v48 = vmax.f32 %v596_v42, 0.0  ;;  %v676_v49 = vmax.f32 %v612_v43, 0.0 }
  0xe2   :  { %v1065_v50 = vpack.c.bf16 %v660_v48, %v659_v46  ;;  %v1105_v51 = vpack.c.bf16 %v676_v49, %v675_v47  ;;  %v460_v52 = vpop.f32.mrf.mxu2  ;;  %v500_v53 = vpop.f32.mrf.mxu3 }
  0xe3   :  { %v560_v56 = vmul.f32 %v1392_v36, %v460_v52  ;;  %v576_v57 = vmul.f32 %v1392_v36, %v500_v53  ;;  %v383_v58 = vpop.f32.mrf.mxu0  ;;  %v423_v59 = vpop.f32.mrf.mxu1 }
  0xe4   :  { %1201 = vst [vmem:[%s1627_s4 + $0x28] sm:$0xff] %v1065_v50   ;;  %v529_v2 = vmul.f32 %v1392_v36, %v383_v58  ;;  %v545_v3 = vmul.f32 %v1392_v36, %v423_v59 }
  0xe5   :  { %1209 = vst [vmem:[%s1627_s4 + $0x68] sm:$0xff] %v1105_v51   ;;  %v628_v60 = vadd.f32 %v1398_v38, %v560_v56  ;;  %v644_v61 = vadd.f32 %v1398_v38, %v576_v57 }
  0xe6   :  { %v597_v10 = vadd.f32 %v1398_v38, %v529_v2  ;;  %v613_v11 = vadd.f32 %v1398_v38, %v545_v3 }
  0xe7   :  { %v692_v0 = vmax.f32 %v628_v60, 0.0  ;;  %v708_v1 = vmax.f32 %v644_v61, 0.0 }
  0xe8   :  { %v661_v18 = vmax.f32 %v597_v10, 0.0  ;;  %v677_v19 = vmax.f32 %v613_v11, 0.0 }
  0xe9   :  { %v1145_v4 = vpack.c.bf16 %v692_v0, %v691_v62  ;;  %v1185_v5 = vpack.c.bf16 %v708_v1, %v707_v63 }
  0xea   :  { %v463_v6 = vpop.f32.mrf.mxu2  ;;  %v503_v7 = vpop.f32.mrf.mxu3 }
  0xeb   :  { %1217 = vst [vmem:[%s1627_s4 + $0xa8] sm:$0xff] %v1145_v4   ;;  %v385_v8 = vpop.f32.mrf.mxu0  ;;  %v425_v9 = vpop.f32.mrf.mxu1  ;;  %v561_v16 = vmul.f32 %v1392_v36, %v463_v6  ;;  %v577_v17 = vmul.f32 %v1392_v36, %v503_v7 }
  0xec   :  { %1225 = vst [vmem:[%s1627_s4 + $0xe8] sm:$0xff] %v1185_v5   ;;  %v530_v12 = vmul.f32 %v1392_v36, %v385_v8  ;;  %v546_v13 = vmul.f32 %v1392_v36, %v425_v9 }
  0xed   :  { %v629_v26 = vadd.f32 %v1398_v38, %v561_v16  ;;  %v645_v27 = vadd.f32 %v1398_v38, %v577_v17 }
  0xee   :  { %v598_v14 = vadd.f32 %v1398_v38, %v530_v12  ;;  %v614_v15 = vadd.f32 %v1398_v38, %v546_v13 }
  0xef   :  { %v693_v34 = vmax.f32 %v629_v26, 0.0  ;;  %v709_v35 = vmax.f32 %v645_v27, 0.0 }
  0xf0   :  { %v662_v20 = vmax.f32 %v598_v14, 0.0  ;;  %v678_v21 = vmax.f32 %v614_v15, 0.0 }
  0xf2   :  { %v1070_v22 = vpack.c.bf16 %v662_v20, %v661_v18  ;;  %v1110_v23 = vpack.c.bf16 %v678_v21, %v677_v19  ;;  %v465_v24 = vpop.f32.mrf.mxu2  ;;  %v505_v25 = vpop.f32.mrf.mxu3 }
  0xf3   :  { %v562_v28 = vmul.f32 %v1392_v36, %v465_v24  ;;  %v578_v29 = vmul.f32 %v1392_v36, %v505_v25  ;;  %v388_v30 = vpop.f32.mrf.mxu0  ;;  %v428_v31 = vpop.f32.mrf.mxu1 }
  0xf4   :  { %1202 = vst [vmem:[%s1627_s4 + $0x30] sm:$0xff] %v1070_v22   ;;  %v531_v40 = vmul.f32 %v1392_v36, %v388_v30  ;;  %v547_v41 = vmul.f32 %v1392_v36, %v428_v31 }
  0xf5   :  { %1210 = vst [vmem:[%s1627_s4 + $0x70] sm:$0xff] %v1110_v23   ;;  %v630_v32 = vadd.f32 %v1398_v38, %v562_v28  ;;  %v646_v33 = vadd.f32 %v1398_v38, %v578_v29 }
  0xf6   :  { %v599_v48 = vadd.f32 %v1398_v38, %v531_v40  ;;  %v615_v49 = vadd.f32 %v1398_v38, %v547_v41 }
  0xf7   :  { %v694_v37 = vmax.f32 %v630_v32, 0.0  ;;  %v710_v39 = vmax.f32 %v646_v33, 0.0 }
  0xf8   :  { %v663_v56 = vmax.f32 %v599_v48, 0.0  ;;  %v679_v57 = vmax.f32 %v615_v49, 0.0 }
  0xf9   :  { %v1150_v42 = vpack.c.bf16 %v694_v37, %v693_v34  ;;  %v1190_v43 = vpack.c.bf16 %v710_v39, %v709_v35 }
  0xfa   :  { %v468_v44 = vpop.f32.mrf.mxu2  ;;  %v508_v45 = vpop.f32.mrf.mxu3 }
  0xfb   :  { %1218 = vst [vmem:[%s1627_s4 + $0xb0] sm:$0xff] %v1150_v42   ;;  %v390_v46 = vpop.f32.mrf.mxu0  ;;  %v430_v47 = vpop.f32.mrf.mxu1  ;;  %v563_v54 = vmul.f32 %v1392_v36, %v468_v44  ;;  %v579_v55 = vmul.f32 %v1392_v36, %v508_v45 }
  0xfc   :  { %1226 = vst [vmem:[%s1627_s4 + $0xf0] sm:$0xff] %v1190_v43   ;;  %v532_v50 = vmul.f32 %v1392_v36, %v390_v46  ;;  %v548_v51 = vmul.f32 %v1392_v36, %v430_v47 }
  0xfd   :  { %v631_v0 = vadd.f32 %v1398_v38, %v563_v54  ;;  %v647_v1 = vadd.f32 %v1398_v38, %v579_v55 }
  0xfe   :  { %v600_v52 = vadd.f32 %v1398_v38, %v532_v50  ;;  %v616_v53 = vadd.f32 %v1398_v38, %v548_v51 }
  0xff   :  { %v695_v6 = vmax.f32 %v631_v0, 0.0  ;;  %v711_v7 = vmax.f32 %v647_v1, 0.0 }
 0x100   :  { %v664_v58 = vmax.f32 %v600_v52, 0.0  ;;  %v680_v59 = vmax.f32 %v616_v53, 0.0 }
 0x102   :  { %v1075_v60 = vpack.c.bf16 %v664_v58, %v663_v56  ;;  %v1115_v61 = vpack.c.bf16 %v680_v59, %v679_v57  ;;  %v470_v62 = vpop.f32.mrf.mxu2  ;;  %v510_v63 = vpop.f32.mrf.mxu3 }
 0x103   :  { %v564_v2 = vmul.f32 %v1392_v36, %v470_v62  ;;  %v580_v3 = vmul.f32 %v1392_v36, %v510_v63 }
 0x104   :  { %1203 = vst [vmem:[%s1627_s4 + $0x38] sm:$0xff] %v1075_v60  }
 0x105   :  { %1211 = vst [vmem:[%s1627_s4 + $0x78] sm:$0xff] %v1115_v61   ;;  %v632_v4 = vadd.f32 %v1398_v38, %v564_v2  ;;  %v648_v5 = vadd.f32 %v1398_v38, %v580_v3 }
 0x107   :  { %v696_v8 = vmax.f32 %v632_v4, 0.0  ;;  %v712_v9 = vmax.f32 %v648_v5, 0.0 }
 0x109   :  { %v1155_v10 = vpack.c.bf16 %v696_v8, %v695_v6  ;;  %v1195_v11 = vpack.c.bf16 %v712_v9, %v711_v7 }
 0x10b   :  { %1219 = vst [vmem:[%s1627_s4 + $0xb8] sm:$0xff] %v1155_v10  }
 0x10c   :  { %1227 = vst [vmem:[%s1627_s4 + $0xf8] sm:$0xff] %v1195_v11  }

// kernel: decoder_forward.7
= control target key start
LH: loop header
LB: loop body
LE: loop exit
PB: predicated region body
PF: predicated region fallthrough
CT: control target
= control target key end

     0   :  { %s1266_s15 = smov 0   ;;  %s1560_s0 = inlined_call_operand.vmem [shape: bf16[2048,4], index: 0, kind: input, shape index: {}]   ;;  %s1561_s1 = inlined_call_operand.vmem [shape: bf16[4,128], index: 1, kind: input, shape index: {}]   ;;  %s1562_s2 = inlined_call_operand.vmem [shape: f32[1,128], index: 2, kind: input, shape index: {}]   ;;  %s1563_s3 = inlined_call_operand.vmem [shape: f32[1,128], index: 3, kind: input, shape index: {}]   ;;  %s1564_s4 = inlined_call_operand.vmem [shape: f32[2048,128], index: 4, kind: output, shape index: {}]  }
   0x1 LB: > { %s1017_s16 = sadd.s32 4294967295, %s1239_s15   ;;  %p1021_p0 = scmp.ge.s32.totalorder %s1239_s15, 1  ;;  %s1239_s15 = sphi %s1266_s15, %s14_s15  }
   0x2   : > { %p163_p1 = scmp.lt.s32.totalorder %s1239_s15, 5 }
   0x4   : > { %p164_p2 = pnand %p1021_p0, %p163_p1 }
   0x5   : > { %s1022_s19 = sshll.u32 (!%p164_p2), %s1017_s16, 6 }
   0x6   : > { %167 = sbr.rel (%p164_p2) target bundleno = 277 (0x115), region = 36  ;;  %p190_p3 = scmp.lt.s32.totalorder (!%p164_p2), %s1022_s19, 255 }
   0xb   : > { %v266_v0 = vld [vmem:[%s1561_s1] sm:$0x3]  ;;  %vm524_vm0 = vcmask 1041408   ;;  %s1566_s19 = smov (!%p190_p3, %s1022_s19), 255  ;;  %vm427_vm1 = vcmask 31744  }
   0xc   : > { %v526_v1 = vsel %vm524_vm0, %v266_v0, 0  ;;  %s1023_s20 = sshll.u32 %s1566_s19, 2  ;;  %v1352_v34 = vld [vmem:[%s1562_s2] ss:$0 sm:$0xff]  ;;  %s1025_s28 = sshll.u32 %s1566_s19, 3 }
   0xd   : > { %535 = vmatpush.bf16.msra.mxu0 %v526_v1  ;;  %1220 = vmatpush.bf16.msra.mxu1 %v526_v1  ;;  %s1283_s23 = scalar_lea.vmem %s1560_s0, %s1023_s20  ;;  %v1357_v35 = vld [vmem:[%s1563_s3] ss:$0 sm:$0xff]  ;;  %s1367_s5 = scalar_lea.vmem %s1564_s4, %s1025_s28 }
   0xe   : > { %1221 = vmatpush.bf16.msra.mxu2 %v526_v1  ;;  %1222 = vmatpush.bf16.msra.mxu3 %v526_v1  ;;  %v1188_v2 = vld [vmem:[%s1283_s23] sm:$0xff]  ;;  %v1189_v6 = vld [vmem:[%s1283_s23 + $0x8] sm:$0xff]  ;;  %v1190_v10 = vld [vmem:[%s1283_s23 + $0x10] sm:$0xff] }
   0xf   : > { %v1196_v3 = vld [vmem:[%s1283_s23 + $0x40] sm:$0xff]  ;;  %v1197_v7 = vld [vmem:[%s1283_s23 + $0x48] sm:$0xff]  ;;  %v1198_v11 = vld [vmem:[%s1283_s23 + $0x50] sm:$0xff] }
  0x10   : > { %v1204_v4 = vld [vmem:[%s1283_s23 + $0x80] sm:$0xff]  ;;  %1154 = vmatmul.msk.bf16.vlgmr.msra.gmra.mxu0 %vm427_vm1, %v1188_v2  ;;  %1162 = vmatmul.msk.bf16.vlgmr.msra.gmra.mxu1 %vm427_vm1, %v1196_v3  ;;  %v1205_v8 = vld [vmem:[%s1283_s23 + $0x88] sm:$0xff]  ;;  %v1206_v12 = vld [vmem:[%s1283_s23 + $0x90] sm:$0xff] }
  0x11   : > { %v1212_v5 = vld [vmem:[%s1283_s23 + $0xc0] sm:$0xff]  ;;  %1170 = vmatmul.msk.bf16.vlgmr.msra.gmra.mxu2 %vm427_vm1, %v1204_v4  ;;  %v1213_v9 = vld [vmem:[%s1283_s23 + $0xc8] sm:$0xff]  ;;  %v1214_v13 = vld [vmem:[%s1283_s23 + $0xd0] sm:$0xff] }
  0x12   : > { %1178 = vmatmul.msk.bf16.vlgmr.msra.gmra.mxu3 %vm427_vm1, %v1212_v5  ;;  %v1191_v14 = vld [vmem:[%s1283_s23 + $0x18] sm:$0xff]  ;;  %v1192_v18 = vld [vmem:[%s1283_s23 + $0x20] sm:$0xff]  ;;  %v1193_v22 = vld [vmem:[%s1283_s23 + $0x28] sm:$0xff] }
  0x13   : > { %v1199_v15 = vld [vmem:[%s1283_s23 + $0x58] sm:$0xff]  ;;  %v1200_v19 = vld [vmem:[%s1283_s23 + $0x60] sm:$0xff]  ;;  %v1201_v23 = vld [vmem:[%s1283_s23 + $0x68] sm:$0xff] }
  0x14   : > { %v1207_v16 = vld [vmem:[%s1283_s23 + $0x98] sm:$0xff]  ;;  %v1208_v20 = vld [vmem:[%s1283_s23 + $0xa0] sm:$0xff]  ;;  %v1209_v24 = vld [vmem:[%s1283_s23 + $0xa8] sm:$0xff] }
  0x15   : > { %v1215_v17 = vld [vmem:[%s1283_s23 + $0xd8] sm:$0xff]  ;;  %v1216_v21 = vld [vmem:[%s1283_s23 + $0xe0] sm:$0xff]  ;;  %v1217_v25 = vld [vmem:[%s1283_s23 + $0xe8] sm:$0xff] }
  0x16   : > { %v1194_v26 = vld [vmem:[%s1283_s23 + $0x30] sm:$0xff]  ;;  %v1195_v30 = vld [vmem:[%s1283_s23 + $0x38] sm:$0xff] }
  0x17   : > { %v1202_v27 = vld [vmem:[%s1283_s23 + $0x70] sm:$0xff]  ;;  %v1203_v31 = vld [vmem:[%s1283_s23 + $0x78] sm:$0xff] }
  0x18   : > { %v1210_v28 = vld [vmem:[%s1283_s23 + $0xb0] sm:$0xff]  ;;  %v1211_v32 = vld [vmem:[%s1283_s23 + $0xb8] sm:$0xff] }
  0x19   : > { %v1218_v29 = vld [vmem:[%s1283_s23 + $0xf0] sm:$0xff]  ;;  %v1219_v33 = vld [vmem:[%s1283_s23 + $0xf8] sm:$0xff] }
  0x20   : > { %1155 = vmatmul.msk.bf16.gmra.mxu0 %vm427_vm1, %v1189_v6  ;;  %1163 = vmatmul.msk.bf16.gmra.mxu1 %vm427_vm1, %v1197_v7 }
  0x21   : > { %1171 = vmatmul.msk.bf16.gmra.mxu2 %vm427_vm1, %v1205_v8 }
  0x22   : > { %1179 = vmatmul.msk.bf16.gmra.mxu3 %vm427_vm1, %v1213_v9 }
  0x30   : > { %1156 = vmatmul.msk.bf16.gmra.mxu0 %vm427_vm1, %v1190_v10  ;;  %1164 = vmatmul.msk.bf16.gmra.mxu1 %vm427_vm1, %v1198_v11 }
  0x31   : > { %1172 = vmatmul.msk.bf16.gmra.mxu2 %vm427_vm1, %v1206_v12 }
  0x32   : > { %1180 = vmatmul.msk.bf16.gmra.mxu3 %vm427_vm1, %v1214_v13 }
  0x40   : > { %1157 = vmatmul.msk.bf16.gmra.mxu0 %vm427_vm1, %v1191_v14  ;;  %1165 = vmatmul.msk.bf16.gmra.mxu1 %vm427_vm1, %v1199_v15 }
  0x41   : > { %1173 = vmatmul.msk.bf16.gmra.mxu2 %vm427_vm1, %v1207_v16 }
  0x42   : > { %1181 = vmatmul.msk.bf16.gmra.mxu3 %vm427_vm1, %v1215_v17 }
  0x50   : > { %1158 = vmatmul.msk.bf16.gmra.mxu0 %vm427_vm1, %v1192_v18  ;;  %1166 = vmatmul.msk.bf16.gmra.mxu1 %vm427_vm1, %v1200_v19 }
  0x51   : > { %1174 = vmatmul.msk.bf16.gmra.mxu2 %vm427_vm1, %v1208_v20 }
  0x52   : > { %1182 = vmatmul.msk.bf16.gmra.mxu3 %vm427_vm1, %v1216_v21 }
  0x60   : > { %1159 = vmatmul.msk.bf16.gmra.mxu0 %vm427_vm1, %v1193_v22  ;;  %1167 = vmatmul.msk.bf16.gmra.mxu1 %vm427_vm1, %v1201_v23 }
  0x61   : > { %1175 = vmatmul.msk.bf16.gmra.mxu2 %vm427_vm1, %v1209_v24 }
  0x62   : > { %1183 = vmatmul.msk.bf16.gmra.mxu3 %vm427_vm1, %v1217_v25 }
  0x70   : > { %1160 = vmatmul.msk.bf16.gmra.mxu0 %vm427_vm1, %v1194_v26  ;;  %1168 = vmatmul.msk.bf16.gmra.mxu1 %vm427_vm1, %v1202_v27 }
  0x71   : > { %1176 = vmatmul.msk.bf16.gmra.mxu2 %vm427_vm1, %v1210_v28 }
  0x72   : > { %1184 = vmatmul.msk.bf16.gmra.mxu3 %vm427_vm1, %v1218_v29 }
  0x80   : > { %1161 = vmatmul.msk.bf16.gmra.mxu0 %vm427_vm1, %v1195_v30  ;;  %1169 = vmatmul.msk.bf16.gmra.mxu1 %vm427_vm1, %v1203_v31 }
  0x81   : > { %1177 = vmatmul.msk.bf16.gmra.mxu2 %vm427_vm1, %v1211_v32 }
  0x82   : > { %1185 = vmatmul.msk.bf16.gmra.mxu3 %vm427_vm1, %v1219_v33 }
  0x8d   : > { %v537_v36 = vpop.f32.mrf.mxu0  ;;  %v577_v37 = vpop.f32.mrf.mxu1 }
  0x8e   : > { %v701_v38 = vmul.f32 %v1352_v34, %v537_v36  ;;  %v717_v39 = vmul.f32 %v1352_v34, %v577_v37 }
  0x90   : > { %v769_v40 = vadd.f32 %v1357_v35, %v701_v38  ;;  %v785_v41 = vadd.f32 %v1357_v35, %v717_v39 }
  0x92   : > { %v833_v42 = vmax.f32 %v769_v40, 0.0  ;;  %v849_v43 = vmax.f32 %v785_v41, 0.0 }
  0x94   : > { %897 = vst [vmem:[%s1367_s5] sm:$0xff] %v833_v42  ;;  %v617_v44 = vpop.f32.mrf.mxu2 }
  0x95   : > { %v657_v45 = vpop.f32.mrf.mxu3  ;;  %913 = vst [vmem:[%s1367_s5 + $0x80] sm:$0xff] %v849_v43  ;;  %v733_v46 = vmul.f32 %v1352_v34, %v617_v44  ;;  %v539_v48 = vpop.f32.mrf.mxu0 }
  0x96   : > { %v749_v47 = vmul.f32 %v1352_v34, %v657_v45  ;;  %v579_v49 = vpop.f32.mrf.mxu1  ;;  %v702_v50 = vmul.f32 %v1352_v34, %v539_v48 }
  0x97   : > { %v718_v51 = vmul.f32 %v1352_v34, %v579_v49  ;;  %v801_v52 = vadd.f32 %v1357_v35, %v733_v46 }
  0x98   : > { %v817_v53 = vadd.f32 %v1357_v35, %v749_v47  ;;  %v770_v54 = vadd.f32 %v1357_v35, %v702_v50 }
  0x99   : > { %v786_v55 = vadd.f32 %v1357_v35, %v718_v51  ;;  %v865_v56 = vmax.f32 %v801_v52, 0.0 }
  0x9a   : > { %v881_v57 = vmax.f32 %v817_v53, 0.0  ;;  %v834_v58 = vmax.f32 %v770_v54, 0.0 }
  0x9b   : > { %v850_v59 = vmax.f32 %v786_v55, 0.0  ;;  %929 = vst [vmem:[%s1367_s5 + $0x100] sm:$0xff] %v865_v56 }
  0x9c   : > { %945 = vst [vmem:[%s1367_s5 + $0x180] sm:$0xff] %v881_v57  ;;  %v619_v60 = vpop.f32.mrf.mxu2 }
  0x9d   : > { %v659_v61 = vpop.f32.mrf.mxu3  ;;  %898 = vst [vmem:[%s1367_s5 + $0x8] sm:$0xff] %v834_v58  ;;  %v734_v62 = vmul.f32 %v1352_v34, %v619_v60  ;;  %v542_v0 = vpop.f32.mrf.mxu0 }
  0x9e   : > { %v750_v63 = vmul.f32 %v1352_v34, %v659_v61  ;;  %v582_v1 = vpop.f32.mrf.mxu1  ;;  %914 = vst [vmem:[%s1367_s5 + $0x88] sm:$0xff] %v850_v59  ;;  %v703_v2 = vmul.f32 %v1352_v34, %v542_v0 }
  0x9f   : > { %v719_v3 = vmul.f32 %v1352_v34, %v582_v1  ;;  %v802_v4 = vadd.f32 %v1357_v35, %v734_v62 }
  0xa0   : > { %v818_v5 = vadd.f32 %v1357_v35, %v750_v63  ;;  %v771_v6 = vadd.f32 %v1357_v35, %v703_v2 }
  0xa1   : > { %v787_v7 = vadd.f32 %v1357_v35, %v719_v3  ;;  %v866_v8 = vmax.f32 %v802_v4, 0.0 }
  0xa2   : > { %v882_v9 = vmax.f32 %v818_v5, 0.0  ;;  %v835_v10 = vmax.f32 %v771_v6, 0.0 }
  0xa3   : > { %v851_v11 = vmax.f32 %v787_v7, 0.0  ;;  %930 = vst [vmem:[%s1367_s5 + $0x108] sm:$0xff] %v866_v8 }
  0xa4   : > { %946 = vst [vmem:[%s1367_s5 + $0x188] sm:$0xff] %v882_v9  ;;  %v622_v12 = vpop.f32.mrf.mxu2 }
  0xa5   : > { %v662_v13 = vpop.f32.mrf.mxu3  ;;  %899 = vst [vmem:[%s1367_s5 + $0x10] sm:$0xff] %v835_v10  ;;  %v735_v14 = vmul.f32 %v1352_v34, %v622_v12  ;;  %v544_v16 = vpop.f32.mrf.mxu0 }
  0xa6   : > { %v751_v15 = vmul.f32 %v1352_v34, %v662_v13  ;;  %v584_v17 = vpop.f32.mrf.mxu1  ;;  %915 = vst [vmem:[%s1367_s5 + $0x90] sm:$0xff] %v851_v11  ;;  %v704_v18 = vmul.f32 %v1352_v34, %v544_v16 }
  0xa7   : > { %v720_v19 = vmul.f32 %v1352_v34, %v584_v17  ;;  %v803_v20 = vadd.f32 %v1357_v35, %v735_v14 }
  0xa8   : > { %v819_v21 = vadd.f32 %v1357_v35, %v751_v15  ;;  %v772_v22 = vadd.f32 %v1357_v35, %v704_v18 }
  0xa9   : > { %v788_v23 = vadd.f32 %v1357_v35, %v720_v19  ;;  %v867_v24 = vmax.f32 %v803_v20, 0.0 }
  0xaa   : > { %v883_v25 = vmax.f32 %v819_v21, 0.0  ;;  %v836_v26 = vmax.f32 %v772_v22, 0.0 }
  0xab   : > { %v852_v27 = vmax.f32 %v788_v23, 0.0  ;;  %931 = vst [vmem:[%s1367_s5 + $0x110] sm:$0xff] %v867_v24 }
  0xac   : > { %947 = vst [vmem:[%s1367_s5 + $0x190] sm:$0xff] %v883_v25  ;;  %v624_v28 = vpop.f32.mrf.mxu2 }
  0xad   : > { %v664_v29 = vpop.f32.mrf.mxu3  ;;  %900 = vst [vmem:[%s1367_s5 + $0x18] sm:$0xff] %v836_v26  ;;  %v736_v30 = vmul.f32 %v1352_v34, %v624_v28  ;;  %v547_v32 = vpop.f32.mrf.mxu0 }
  0xae   : > { %v752_v31 = vmul.f32 %v1352_v34, %v664_v29  ;;  %v587_v33 = vpop.f32.mrf.mxu1  ;;  %916 = vst [vmem:[%s1367_s5 + $0x98] sm:$0xff] %v852_v27  ;;  %v705_v36 = vmul.f32 %v1352_v34, %v547_v32 }
  0xaf   : > { %v721_v37 = vmul.f32 %v1352_v34, %v587_v33  ;;  %v804_v38 = vadd.f32 %v1357_v35, %v736_v30 }
  0xb0   : > { %v820_v39 = vadd.f32 %v1357_v35, %v752_v31  ;;  %v773_v40 = vadd.f32 %v1357_v35, %v705_v36 }
  0xb1   : > { %v789_v41 = vadd.f32 %v1357_v35, %v721_v37  ;;  %v868_v42 = vmax.f32 %v804_v38, 0.0 }
  0xb2   : > { %v884_v43 = vmax.f32 %v820_v39, 0.0  ;;  %v837_v44 = vmax.f32 %v773_v40, 0.0 }
  0xb3   : > { %v853_v45 = vmax.f32 %v789_v41, 0.0  ;;  %932 = vst [vmem:[%s1367_s5 + $0x118] sm:$0xff] %v868_v42 }
  0xb4   : > { %948 = vst [vmem:[%s1367_s5 + $0x198] sm:$0xff] %v884_v43  ;;  %v627_v46 = vpop.f32.mrf.mxu2 }
  0xb5   : > { %v667_v47 = vpop.f32.mrf.mxu3  ;;  %901 = vst [vmem:[%s1367_s5 + $0x20] sm:$0xff] %v837_v44  ;;  %v737_v48 = vmul.f32 %v1352_v34, %v627_v46  ;;  %v549_v50 = vpop.f32.mrf.mxu0 }
  0xb6   : > { %v753_v49 = vmul.f32 %v1352_v34, %v667_v47  ;;  %v589_v51 = vpop.f32.mrf.mxu1  ;;  %917 = vst [vmem:[%s1367_s5 + $0xa0] sm:$0xff] %v853_v45  ;;  %v706_v52 = vmul.f32 %v1352_v34, %v549_v50 }
  0xb7   : > { %v722_v53 = vmul.f32 %v1352_v34, %v589_v51  ;;  %v805_v54 = vadd.f32 %v1357_v35, %v737_v48 }
  0xb8   : > { %v821_v55 = vadd.f32 %v1357_v35, %v753_v49  ;;  %v774_v56 = vadd.f32 %v1357_v35, %v706_v52 }
  0xb9   : > { %v790_v57 = vadd.f32 %v1357_v35, %v722_v53  ;;  %v869_v58 = vmax.f32 %v805_v54, 0.0 }
  0xba   : > { %v885_v59 = vmax.f32 %v821_v55, 0.0  ;;  %v838_v60 = vmax.f32 %v774_v56, 0.0 }
  0xbb   : > { %v854_v61 = vmax.f32 %v790_v57, 0.0  ;;  %933 = vst [vmem:[%s1367_s5 + $0x120] sm:$0xff] %v869_v58 }
  0xbc   : > { %949 = vst [vmem:[%s1367_s5 + $0x1a0] sm:$0xff] %v885_v59  ;;  %v629_v62 = vpop.f32.mrf.mxu2 }
  0xbd   : > { %v669_v63 = vpop.f32.mrf.mxu3  ;;  %902 = vst [vmem:[%s1367_s5 + $0x28] sm:$0xff] %v838_v60  ;;  %v738_v0 = vmul.f32 %v1352_v34, %v629_v62  ;;  %v552_v2 = vpop.f32.mrf.mxu0 }
  0xbe   : > { %v754_v1 = vmul.f32 %v1352_v34, %v669_v63  ;;  %v592_v3 = vpop.f32.mrf.mxu1  ;;  %918 = vst [vmem:[%s1367_s5 + $0xa8] sm:$0xff] %v854_v61  ;;  %v707_v4 = vmul.f32 %v1352_v34, %v552_v2 }
  0xbf   : > { %v723_v5 = vmul.f32 %v1352_v34, %v592_v3  ;;  %v806_v6 = vadd.f32 %v1357_v35, %v738_v0 }
  0xc0   : > { %v822_v7 = vadd.f32 %v1357_v35, %v754_v1  ;;  %v775_v8 = vadd.f32 %v1357_v35, %v707_v4 }
  0xc1   : > { %v791_v9 = vadd.f32 %v1357_v35, %v723_v5  ;;  %v870_v10 = vmax.f32 %v806_v6, 0.0 }
  0xc2   : > { %v886_v11 = vmax.f32 %v822_v7, 0.0  ;;  %v839_v12 = vmax.f32 %v775_v8, 0.0 }
  0xc3   : > { %v855_v13 = vmax.f32 %v791_v9, 0.0  ;;  %934 = vst [vmem:[%s1367_s5 + $0x128] sm:$0xff] %v870_v10 }
  0xc4   : > { %950 = vst [vmem:[%s1367_s5 + $0x1a8] sm:$0xff] %v886_v11  ;;  %v632_v14 = vpop.f32.mrf.mxu2 }
  0xc5   : > { %v672_v15 = vpop.f32.mrf.mxu3  ;;  %903 = vst [vmem:[%s1367_s5 + $0x30] sm:$0xff] %v839_v12  ;;  %v739_v16 = vmul.f32 %v1352_v34, %v632_v14  ;;  %v554_v18 = vpop.f32.mrf.mxu0 }
  0xc6   : > { %v755_v17 = vmul.f32 %v1352_v34, %v672_v15  ;;  %v594_v19 = vpop.f32.mrf.mxu1  ;;  %919 = vst [vmem:[%s1367_s5 + $0xb0] sm:$0xff] %v855_v13  ;;  %v708_v20 = vmul.f32 %v1352_v34, %v554_v18 }
  0xc7   : > { %v724_v21 = vmul.f32 %v1352_v34, %v594_v19  ;;  %v807_v22 = vadd.f32 %v1357_v35, %v739_v16 }
  0xc8   : > { %v823_v23 = vadd.f32 %v1357_v35, %v755_v17  ;;  %v776_v24 = vadd.f32 %v1357_v35, %v708_v20 }
  0xc9   : > { %v792_v25 = vadd.f32 %v1357_v35, %v724_v21  ;;  %v871_v26 = vmax.f32 %v807_v22, 0.0 }
  0xca   : > { %v887_v27 = vmax.f32 %v823_v23, 0.0  ;;  %v840_v28 = vmax.f32 %v776_v24, 0.0 }
  0xcb   : > { %v856_v29 = vmax.f32 %v792_v25, 0.0  ;;  %935 = vst [vmem:[%s1367_s5 + $0x130] sm:$0xff] %v871_v26 }
  0xcc   : > { %951 = vst [vmem:[%s1367_s5 + $0x1b0] sm:$0xff] %v887_v27  ;;  %v634_v30 = vpop.f32.mrf.mxu2 }
  0xcd   : > { %v674_v31 = vpop.f32.mrf.mxu3  ;;  %904 = vst [vmem:[%s1367_s5 + $0x38] sm:$0xff] %v840_v28  ;;  %v740_v32 = vmul.f32 %v1352_v34, %v634_v30  ;;  %v557_v36 = vpop.f32.mrf.mxu0 }
  0xce   : > { %v756_v33 = vmul.f32 %v1352_v34, %v674_v31  ;;  %v597_v37 = vpop.f32.mrf.mxu1  ;;  %920 = vst [vmem:[%s1367_s5 + $0xb8] sm:$0xff] %v856_v29  ;;  %v709_v38 = vmul.f32 %v1352_v34, %v557_v36 }
  0xcf   : > { %v725_v39 = vmul.f32 %v1352_v34, %v597_v37  ;;  %v808_v40 = vadd.f32 %v1357_v35, %v740_v32 }
  0xd0   : > { %v824_v41 = vadd.f32 %v1357_v35, %v756_v33  ;;  %v777_v42 = vadd.f32 %v1357_v35, %v709_v38 }
  0xd1   : > { %v793_v43 = vadd.f32 %v1357_v35, %v725_v39  ;;  %v872_v44 = vmax.f32 %v808_v40, 0.0 }
  0xd2   : > { %v888_v45 = vmax.f32 %v824_v41, 0.0  ;;  %v841_v46 = vmax.f32 %v777_v42, 0.0 }
  0xd3   : > { %v857_v47 = vmax.f32 %v793_v43, 0.0  ;;  %936 = vst [vmem:[%s1367_s5 + $0x138] sm:$0xff] %v872_v44 }
  0xd4   : > { %952 = vst [vmem:[%s1367_s5 + $0x1b8] sm:$0xff] %v888_v45  ;;  %v637_v48 = vpop.f32.mrf.mxu2 }
  0xd5   : > { %v677_v49 = vpop.f32.mrf.mxu3  ;;  %905 = vst [vmem:[%s1367_s5 + $0x40] sm:$0xff] %v841_v46  ;;  %v741_v50 = vmul.f32 %v1352_v34, %v637_v48  ;;  %v559_v52 = vpop.f32.mrf.mxu0 }
  0xd6   : > { %v757_v51 = vmul.f32 %v1352_v34, %v677_v49  ;;  %v599_v53 = vpop.f32.mrf.mxu1  ;;  %921 = vst [vmem:[%s1367_s5 + $0xc0] sm:$0xff] %v857_v47  ;;  %v710_v54 = vmul.f32 %v1352_v34, %v559_v52 }
  0xd7   : > { %v726_v55 = vmul.f32 %v1352_v34, %v599_v53  ;;  %v809_v56 = vadd.f32 %v1357_v35, %v741_v50 }
  0xd8   : > { %v825_v57 = vadd.f32 %v1357_v35, %v757_v51  ;;  %v778_v58 = vadd.f32 %v1357_v35, %v710_v54 }
  0xd9   : > { %v794_v59 = vadd.f32 %v1357_v35, %v726_v55  ;;  %v873_v60 = vmax.f32 %v809_v56, 0.0 }
  0xda   : > { %v889_v61 = vmax.f32 %v825_v57, 0.0  ;;  %v842_v62 = vmax.f32 %v778_v58, 0.0 }
  0xdb   : > { %v858_v63 = vmax.f32 %v794_v59, 0.0  ;;  %937 = vst [vmem:[%s1367_s5 + $0x140] sm:$0xff] %v873_v60 }
  0xdc   : > { %953 = vst [vmem:[%s1367_s5 + $0x1c0] sm:$0xff] %v889_v61  ;;  %v639_v0 = vpop.f32.mrf.mxu2 }
  0xdd   : > { %v679_v1 = vpop.f32.mrf.mxu3  ;;  %906 = vst [vmem:[%s1367_s5 + $0x48] sm:$0xff] %v842_v62  ;;  %v742_v2 = vmul.f32 %v1352_v34, %v639_v0  ;;  %v562_v4 = vpop.f32.mrf.mxu0 }
  0xde   : > { %v758_v3 = vmul.f32 %v1352_v34, %v679_v1  ;;  %v602_v5 = vpop.f32.mrf.mxu1  ;;  %922 = vst [vmem:[%s1367_s5 + $0xc8] sm:$0xff] %v858_v63  ;;  %v711_v6 = vmul.f32 %v1352_v34, %v562_v4 }
  0xdf   : > { %v727_v7 = vmul.f32 %v1352_v34, %v602_v5  ;;  %v810_v8 = vadd.f32 %v1357_v35, %v742_v2 }
  0xe0   : > { %v826_v9 = vadd.f32 %v1357_v35, %v758_v3  ;;  %v779_v10 = vadd.f32 %v1357_v35, %v711_v6 }
  0xe1   : > { %v795_v11 = vadd.f32 %v1357_v35, %v727_v7  ;;  %v874_v12 = vmax.f32 %v810_v8, 0.0 }
  0xe2   : > { %v890_v13 = vmax.f32 %v826_v9, 0.0  ;;  %v843_v14 = vmax.f32 %v779_v10, 0.0 }
  0xe3   : > { %v859_v15 = vmax.f32 %v795_v11, 0.0  ;;  %938 = vst [vmem:[%s1367_s5 + $0x148] sm:$0xff] %v874_v12 }
  0xe4   : > { %954 = vst [vmem:[%s1367_s5 + $0x1c8] sm:$0xff] %v890_v13  ;;  %v642_v16 = vpop.f32.mrf.mxu2 }
  0xe5   : > { %v682_v17 = vpop.f32.mrf.mxu3  ;;  %907 = vst [vmem:[%s1367_s5 + $0x50] sm:$0xff] %v843_v14  ;;  %v743_v18 = vmul.f32 %v1352_v34, %v642_v16  ;;  %v564_v20 = vpop.f32.mrf.mxu0 }
  0xe6   : > { %v759_v19 = vmul.f32 %v1352_v34, %v682_v17  ;;  %v604_v21 = vpop.f32.mrf.mxu1  ;;  %923 = vst [vmem:[%s1367_s5 + $0xd0] sm:$0xff] %v859_v15  ;;  %v712_v22 = vmul.f32 %v1352_v34, %v564_v20 }
  0xe7   : > { %v728_v23 = vmul.f32 %v1352_v34, %v604_v21  ;;  %v811_v24 = vadd.f32 %v1357_v35, %v743_v18 }
  0xe8   : > { %v827_v25 = vadd.f32 %v1357_v35, %v759_v19  ;;  %v780_v26 = vadd.f32 %v1357_v35, %v712_v22 }
  0xe9   : > { %v796_v27 = vadd.f32 %v1357_v35, %v728_v23  ;;  %v875_v28 = vmax.f32 %v811_v24, 0.0 }
  0xea   : > { %v891_v29 = vmax.f32 %v827_v25, 0.0  ;;  %v844_v30 = vmax.f32 %v780_v26, 0.0 }
  0xeb   : > { %v860_v31 = vmax.f32 %v796_v27, 0.0  ;;  %939 = vst [vmem:[%s1367_s5 + $0x150] sm:$0xff] %v875_v28 }
  0xec   : > { %955 = vst [vmem:[%s1367_s5 + $0x1d0] sm:$0xff] %v891_v29  ;;  %v644_v32 = vpop.f32.mrf.mxu2 }
  0xed   : > { %v684_v33 = vpop.f32.mrf.mxu3  ;;  %908 = vst [vmem:[%s1367_s5 + $0x58] sm:$0xff] %v844_v30  ;;  %v744_v36 = vmul.f32 %v1352_v34, %v644_v32  ;;  %v567_v38 = vpop.f32.mrf.mxu0 }
  0xee   : > { %v760_v37 = vmul.f32 %v1352_v34, %v684_v33  ;;  %v607_v39 = vpop.f32.mrf.mxu1  ;;  %924 = vst [vmem:[%s1367_s5 + $0xd8] sm:$0xff] %v860_v31  ;;  %v713_v40 = vmul.f32 %v1352_v34, %v567_v38 }
  0xef   : > { %v729_v41 = vmul.f32 %v1352_v34, %v607_v39  ;;  %v812_v42 = vadd.f32 %v1357_v35, %v744_v36 }
  0xf0   : > { %v828_v43 = vadd.f32 %v1357_v35, %v760_v37  ;;  %v781_v44 = vadd.f32 %v1357_v35, %v713_v40 }
  0xf1   : > { %v797_v45 = vadd.f32 %v1357_v35, %v729_v41  ;;  %v876_v46 = vmax.f32 %v812_v42, 0.0 }
  0xf2   : > { %v892_v47 = vmax.f32 %v828_v43, 0.0  ;;  %v845_v48 = vmax.f32 %v781_v44, 0.0 }
  0xf3   : > { %v861_v49 = vmax.f32 %v797_v45, 0.0  ;;  %940 = vst [vmem:[%s1367_s5 + $0x158] sm:$0xff] %v876_v46 }
  0xf4   : > { %956 = vst [vmem:[%s1367_s5 + $0x1d8] sm:$0xff] %v892_v47  ;;  %v647_v50 = vpop.f32.mrf.mxu2 }
  0xf5   : > { %v687_v51 = vpop.f32.mrf.mxu3  ;;  %909 = vst [vmem:[%s1367_s5 + $0x60] sm:$0xff] %v845_v48  ;;  %v745_v52 = vmul.f32 %v1352_v34, %v647_v50  ;;  %v569_v54 = vpop.f32.mrf.mxu0 }
  0xf6   : > { %v761_v53 = vmul.f32 %v1352_v34, %v687_v51  ;;  %v609_v55 = vpop.f32.mrf.mxu1  ;;  %925 = vst [vmem:[%s1367_s5 + $0xe0] sm:$0xff] %v861_v49  ;;  %v714_v56 = vmul.f32 %v1352_v34, %v569_v54 }
  0xf7   : > { %v730_v57 = vmul.f32 %v1352_v34, %v609_v55  ;;  %v813_v58 = vadd.f32 %v1357_v35, %v745_v52 }
  0xf8   : > { %v829_v59 = vadd.f32 %v1357_v35, %v761_v53  ;;  %v782_v60 = vadd.f32 %v1357_v35, %v714_v56 }
  0xf9   : > { %v798_v61 = vadd.f32 %v1357_v35, %v730_v57  ;;  %v877_v62 = vmax.f32 %v813_v58, 0.0 }
  0xfa   : > { %v893_v63 = vmax.f32 %v829_v59, 0.0  ;;  %v846_v0 = vmax.f32 %v782_v60, 0.0 }
  0xfb   : > { %v862_v1 = vmax.f32 %v798_v61, 0.0  ;;  %941 = vst [vmem:[%s1367_s5 + $0x160] sm:$0xff] %v877_v62 }
  0xfc   : > { %957 = vst [vmem:[%s1367_s5 + $0x1e0] sm:$0xff] %v893_v63  ;;  %v649_v2 = vpop.f32.mrf.mxu2 }
  0xfd   : > { %v689_v3 = vpop.f32.mrf.mxu3  ;;  %910 = vst [vmem:[%s1367_s5 + $0x68] sm:$0xff] %v846_v0  ;;  %v746_v4 = vmul.f32 %v1352_v34, %v649_v2  ;;  %v572_v6 = vpop.f32.mrf.mxu0 }
  0xfe   : > { %v762_v5 = vmul.f32 %v1352_v34, %v689_v3  ;;  %v612_v7 = vpop.f32.mrf.mxu1  ;;  %926 = vst [vmem:[%s1367_s5 + $0xe8] sm:$0xff] %v862_v1  ;;  %v715_v8 = vmul.f32 %v1352_v34, %v572_v6 }
  0xff   : > { %v731_v9 = vmul.f32 %v1352_v34, %v612_v7  ;;  %v814_v10 = vadd.f32 %v1357_v35, %v746_v4 }
 0x100   : > { %v830_v11 = vadd.f32 %v1357_v35, %v762_v5  ;;  %v783_v12 = vadd.f32 %v1357_v35, %v715_v8 }
 0x101   : > { %v799_v13 = vadd.f32 %v1357_v35, %v731_v9  ;;  %v878_v14 = vmax.f32 %v814_v10, 0.0 }
 0x102   : > { %v894_v15 = vmax.f32 %v830_v11, 0.0  ;;  %v847_v16 = vmax.f32 %v783_v12, 0.0 }
 0x103   : > { %v863_v17 = vmax.f32 %v799_v13, 0.0  ;;  %942 = vst [vmem:[%s1367_s5 + $0x168] sm:$0xff] %v878_v14 }
 0x104   : > { %958 = vst [vmem:[%s1367_s5 + $0x1e8] sm:$0xff] %v894_v15  ;;  %v652_v18 = vpop.f32.mrf.mxu2 }
 0x105   : > { %v692_v19 = vpop.f32.mrf.mxu3  ;;  %911 = vst [vmem:[%s1367_s5 + $0x70] sm:$0xff] %v847_v16  ;;  %v747_v20 = vmul.f32 %v1352_v34, %v652_v18  ;;  %v574_v22 = vpop.f32.mrf.mxu0 }
 0x106   : > { %v763_v21 = vmul.f32 %v1352_v34, %v692_v19  ;;  %v614_v23 = vpop.f32.mrf.mxu1  ;;  %927 = vst [vmem:[%s1367_s5 + $0xf0] sm:$0xff] %v863_v17  ;;  %v716_v24 = vmul.f32 %v1352_v34, %v574_v22 }
 0x107   : > { %v732_v25 = vmul.f32 %v1352_v34, %v614_v23  ;;  %v815_v26 = vadd.f32 %v1357_v35, %v747_v20 }
 0x108   : > { %v831_v27 = vadd.f32 %v1357_v35, %v763_v21  ;;  %v784_v28 = vadd.f32 %v1357_v35, %v716_v24 }
 0x109   : > { %v800_v29 = vadd.f32 %v1357_v35, %v732_v25  ;;  %v879_v30 = vmax.f32 %v815_v26, 0.0 }
 0x10a   : > { %v895_v31 = vmax.f32 %v831_v27, 0.0  ;;  %v848_v32 = vmax.f32 %v784_v28, 0.0 }
 0x10b   : > { %v864_v33 = vmax.f32 %v800_v29, 0.0  ;;  %943 = vst [vmem:[%s1367_s5 + $0x170] sm:$0xff] %v879_v30 }
 0x10c   : > { %959 = vst [vmem:[%s1367_s5 + $0x1f0] sm:$0xff] %v895_v31  ;;  %v654_v36 = vpop.f32.mrf.mxu2 }
 0x10d   : > { %v694_v37 = vpop.f32.mrf.mxu3  ;;  %912 = vst [vmem:[%s1367_s5 + $0x78] sm:$0xff] %v848_v32  ;;  %v748_v38 = vmul.f32 %v1352_v34, %v654_v36 }
 0x10e   : > { %v764_v39 = vmul.f32 %v1352_v34, %v694_v37  ;;  %928 = vst [vmem:[%s1367_s5 + $0xf8] sm:$0xff] %v864_v33 }
 0x10f   : > { %v816_v40 = vadd.f32 %v1357_v35, %v748_v38 }
 0x110   : > { %v832_v41 = vadd.f32 %v1357_v35, %v764_v39 }
 0x111   : > { %v880_v42 = vmax.f32 %v816_v40, 0.0 }
 0x112   : > { %v896_v43 = vmax.f32 %v832_v41, 0.0 }
 0x113   : > { %944 = vst [vmem:[%s1367_s5 + $0x178] sm:$0xff] %v880_v42 }
 0x114   : > { %960 = vst [vmem:[%s1367_s5 + $0x1f8] sm:$0xff] %v896_v43 }
 0x115 PF: > { %s14_s15 = sadd.s32 1, %s1239_s15  }
 0x116   : > { %p11_p4 = scmp.ge.s32.totalorder %s14_s15, 6  }
 0x118   :  { %13 = sbr.rel (!%p11_p4) target bundleno = 1 (0x1), region = 66 }

</bundles_post_ra>
